<compile_context>
chip_gen: v7x
topology: tpu7x:2x2x1
jax: 0.10.0
libtpu: 0.0.40
codegen_flags: <defaults>
</compile_context>

<pallas_src>
import functools

import jax
import jax.numpy as jnp
from jax import lax
from jax.experimental import pallas as pl
from jax.experimental.pallas import tpu as pltpu


def _conv1x1_bn_kernel(x_ref, w_ref, gamma_ref, beta_ref, o_ref, *, eps, chunk):
    # x_ref:     (Cin, M)        bf16  -- LHS, contracted along dim 0 (MXU-native)
    # w_ref:     (Cin, BLK)      bf16
    # gamma_ref: (1, BLK)        f32
    # beta_ref:  (1, BLK)        f32
    # o_ref:     (M, BLK)        bf16  -- lane-dense output
    m = o_ref.shape[0]
    blk = o_ref.shape[1]
    inv_m = 1.0 / m

    # Chunk the matmul + BN epilogue over 128/256-lane column slices so the
    # live f32 working set stays small (no vreg spills at BLK=1024).
    for c in range(blk // chunk):
        lo = c * chunk
        y = lax.dot_general(
            x_ref[...], w_ref[:, lo:lo + chunk],
            dimension_numbers=(((0,), (0,)), ((), ())),
            preferred_element_type=jnp.float32,
        )  # (M, chunk), f32 accumulation on the MXU

        # BatchNorm2d, training-mode batch statistics (biased variance),
        # two-pass (centered) form for numerical stability.
        mean = jnp.sum(y, axis=0, keepdims=True) * inv_m
        centered = y - mean
        var = jnp.sum(centered * centered, axis=0, keepdims=True) * inv_m
        scale = gamma_ref[:, lo:lo + chunk] * lax.rsqrt(var + eps)
        out = centered * scale + beta_ref[:, lo:lo + chunk]
        o_ref[:, lo:lo + chunk] = out.astype(o_ref.dtype)


def pick_blocking():
    """Pick (block_cout, lane_chunk) per TPU generation.

    v7x (2 TensorCores): 2 x 1024 blocks, one per core ("parallel" grid axis).
    v5e / v6e (1 TensorCore): 3 x 640 blocks -> pad 1824 only to 1920 (~12%
    less weight DMA); extra grid steps are a cheap sequential loop.
    """
    try:
        kind = jax.devices()[0].device_kind.lower()
    except Exception:
        kind = ""
    if "v7" in kind:
        return 1024, 256
    return 640, 128


def prepare_params(w_conv, gamma, beta, *, block_cout):
    """One-time (hoisted) weight / BN-param prep: transpose, pad, bf16 cast."""
    Cout, Cin = w_conv.shape[0], w_conv.shape[1]
    n_blocks = pl.cdiv(Cout, block_cout)
    pad = n_blocks * block_cout - Cout
    w_io = jnp.transpose(w_conv.reshape(Cout, Cin), (1, 0))            # (Cin, Cout)
    w_io = jnp.pad(w_io, ((0, 0), (0, pad))).astype(jnp.bfloat16)       # (Cin, Cout_p)
    gamma_p = jnp.pad(gamma.astype(jnp.float32), (0, pad)).reshape(1, -1)
    beta_p = jnp.pad(beta.astype(jnp.float32), (0, pad)).reshape(1, -1)
    return w_io, gamma_p, beta_p


@functools.partial(
    jax.jit,
    static_argnames=("cout", "eps", "block_cout", "chunk", "channels_last_out"))
def conv1x1_batchnorm(x_nchw, w_io, gamma_p, beta_p, *, cout, eps=1e-3,
                      block_cout=1024, chunk=256, channels_last_out=False):
    """1x1 conv (bias=False) + BatchNorm2d (batch stats).

    x_nchw: (N, Cin, H, W).  w_io / gamma_p / beta_p come from prepare_params().
    Returns NCHW bf16 by default (module semantics); pass channels_last_out=True
    to skip the final layout pass if the consumer takes NHWC.
    """
    N, Cin, H, W = x_nchw.shape
    Cout_p = w_io.shape[1]
    M = N * H * W
    n_blocks = Cout_p // block_cout

    # NCHW -> (Cin, M): for N=1 only the size-1 axis moves, so this is a
    # reshape + bf16 cast; no HWC data shuffle (kernel consumes a transposed LHS).
    x_cm = jnp.transpose(x_nchw, (1, 0, 2, 3)).reshape(Cin, M).astype(jnp.bfloat16)

    cost = pl.CostEstimate(
        flops=2 * M * Cin * Cout_p,
        transcendentals=Cout_p,
        bytes_accessed=(x_cm.size * 2 + w_io.size * 2
                        + (gamma_p.size + beta_p.size) * 4
                        + M * Cout_p * 2),
    )

    out_mat = pl.pallas_call(
        functools.partial(_conv1x1_bn_kernel, eps=eps, chunk=chunk),
        out_shape=jax.ShapeDtypeStruct((M, Cout_p), jnp.bfloat16),
        grid_spec=pltpu.PrefetchScalarGridSpec(
            num_scalar_prefetch=0,
            grid=(n_blocks,),
            in_specs=[
                pl.BlockSpec((Cin, M), lambda j: (0, 0)),           # x (shared)
                pl.BlockSpec((Cin, block_cout), lambda j: (0, j)),  # weights
                pl.BlockSpec((1, block_cout), lambda j: (0, j)),    # gamma
                pl.BlockSpec((1, block_cout), lambda j: (0, j)),    # beta
            ],
            out_specs=pl.BlockSpec((M, block_cout), lambda j: (0, j)),
        ),
        compiler_params=pltpu.CompilerParams(
            dimension_semantics=("parallel",),
        ),
        cost_estimate=cost,
    )(x_cm, w_io, gamma_p, beta_p)

    # TODO(synk): BatchNorm2d running_mean/running_var updates (momentum=0.1) are
    # a training side effect and are not produced; the forward activation matches.
    # TODO(synk): if this layer is called repeatedly, prefetch w_io into VMEM
    # behind the previous layer's compute (cross-pallas_call DMA future, P10).
    out = out_mat[:, :cout].reshape(N, H, W, cout)   # drop channel padding
    if channels_last_out:
        return out
    return jnp.transpose(out, (0, 3, 1, 2))          # NCHW (module semantics)


if __name__ == "__main__":
    # Shapes implied by the module: Conv2d(304 -> 1824, 1x1), input [1, 304, 7, 7].
    N, Cin, H, W = 1, 304, 7, 7
    Cout = 1824
    eps = 1e-3  # torchvision EfficientNetV2 BN eps

    key = jax.random.PRNGKey(0)
    k_x, k_w = jax.random.split(key)
    x = jax.random.normal(k_x, (N, Cin, H, W), dtype=jnp.float32)
    w_conv = jax.random.normal(k_w, (Cout, Cin, 1, 1), dtype=jnp.float32) * 0.05
    # BatchNorm2d affine params, PyTorch defaults: weight=1, bias=0.
    gamma = jnp.ones((Cout,), dtype=jnp.float32)
    beta = jnp.zeros((Cout,), dtype=jnp.float32)

    # One-time parameter prep (hoisted out of the hot path).
    block_cout, chunk = pick_blocking()
    w_io, gamma_p, beta_p = prepare_params(w_conv, gamma, beta, block_cout=block_cout)

    out = conv1x1_batchnorm(x, w_io, gamma_p, beta_p, cout=Cout, eps=eps,
                            block_cout=block_cout, chunk=chunk)
    jax.block_until_ready(out)
    assert out.shape == (N, Cout, H, W), out.shape

    # Pure-JAX f32 reference (loose tolerance: bf16 matmul / bf16 output).
    y_ref = jnp.einsum("nchw,oc->nohw", x, w_conv.reshape(Cout, Cin))
    mean = y_ref.mean(axis=(0, 2, 3), keepdims=True)
    var = y_ref.var(axis=(0, 2, 3), keepdims=True)   # biased, matches BN training
    ref = ((y_ref - mean) * lax.rsqrt(var + eps)
           * gamma.reshape(1, -1, 1, 1) + beta.reshape(1, -1, 1, 1))
    max_err = jnp.max(jnp.abs(out.astype(jnp.float32) - ref))
    assert float(max_err) < 0.1, float(max_err)

    print("KERNEL_OK")
</pallas_src>

<mosaic_0001>
module attributes {stable_mosaic.version = 11 : i64} {
  func.func @_conv1x1_bn_kernel(%arg0: i32, %arg1: memref<304x49xbf16, #tpu.memory_space<vmem>>, %arg2: memref<304x640xbf16, #tpu.memory_space<vmem>>, %arg3: memref<1x640xf32, #tpu.memory_space<vmem>>, %arg4: memref<1x640xf32, #tpu.memory_space<vmem>>, %arg5: memref<49x640xbf16, #tpu.memory_space<vmem>>) attributes {dimension_semantics = [#tpu.dimension_semantics<parallel>], iteration_bounds = array<i64: 3>, scalar_prefetch = 0 : i64, scratch_operands = 0 : i64, tpu.core_type = #tpu.core_type<tc>, window_params = [{pipeline_mode = #tpu.pipeline_mode<synchronous>, transform_indices = @transform_0, window_bounds = array<i64: 304, 49>}, {transform_indices = @transform_1, window_bounds = array<i64: 304, 640>}, {transform_indices = @transform_2, window_bounds = array<i64: 1, 640>}, {transform_indices = @transform_3, window_bounds = array<i64: 1, 640>}, {transform_indices = @transform_4, window_bounds = array<i64: 49, 640>}]} {
    %c0 = arith.constant 0 : index
    %c0_0 = arith.constant 0 : index
    %0 = vector.load %arg1[%c0, %c0_0] : memref<304x49xbf16, #tpu.memory_space<vmem>>, vector<304x49xbf16>
    %c0_1 = arith.constant 0 : index
    %c0_2 = arith.constant 0 : index
    %1 = vector.load %arg2[%c0_1, %c0_2] : memref<304x640xbf16, #tpu.memory_space<vmem>>, vector<304x128xbf16>
    %cst = arith.constant dense<0.000000e+00> : vector<49x128xf32>
    %2 = tpu.matmul %0, %1, %cst {dimension_numbers = #tpu.dot_dimension_numbers<[0], [0], [1], [1], [0, 1, 1, 1], [], []>} : vector<304x49xbf16>, vector<304x128xbf16>, vector<49x128xf32> -> vector<49x128xf32>
    %cst_3 = arith.constant dense<0.000000e+00> : vector<128xf32>
    %3 = vector.multi_reduction <add>, %2, %cst_3 [0] : vector<49x128xf32> to vector<128xf32>
    %4 = vector.shape_cast %3 : vector<128xf32> to vector<1x128xf32>
    %cst_4 = arith.constant 0.0204081628 : f32
    %5 = vector.broadcast %cst_4 : f32 to vector<1x128xf32>
    %6 = arith.mulf %4, %5 : vector<1x128xf32>
    %7 = vector.broadcast %6 : vector<1x128xf32> to vector<49x128xf32>
    %8 = arith.subf %2, %7 : vector<49x128xf32>
    %9 = arith.mulf %8, %8 : vector<49x128xf32>
    %cst_5 = arith.constant dense<0.000000e+00> : vector<128xf32>
    %10 = vector.multi_reduction <add>, %9, %cst_5 [0] : vector<49x128xf32> to vector<128xf32>
    %11 = vector.shape_cast %10 : vector<128xf32> to vector<1x128xf32>
    %cst_6 = arith.constant 0.0204081628 : f32
    %12 = vector.broadcast %cst_6 : f32 to vector<1x128xf32>
    %13 = arith.mulf %11, %12 : vector<1x128xf32>
    %c0_7 = arith.constant 0 : index
    %c0_8 = arith.constant 0 : index
    %14 = vector.load %arg3[%c0_7, %c0_8] : memref<1x640xf32, #tpu.memory_space<vmem>>, vector<1x128xf32>
    %cst_9 = arith.constant 1.000000e-03 : f32
    %15 = vector.broadcast %cst_9 : f32 to vector<1x128xf32>
    %16 = arith.addf %13, %15 : vector<1x128xf32>
    %17 = math.rsqrt %16 : vector<1x128xf32>
    %18 = arith.mulf %14, %17 : vector<1x128xf32>
    %19 = vector.broadcast %18 : vector<1x128xf32> to vector<49x128xf32>
    %20 = arith.mulf %8, %19 : vector<49x128xf32>
    %c0_10 = arith.constant 0 : index
    %c0_11 = arith.constant 0 : index
    %21 = vector.load %arg4[%c0_10, %c0_11] : memref<1x640xf32, #tpu.memory_space<vmem>>, vector<1x128xf32>
    %22 = vector.broadcast %21 : vector<1x128xf32> to vector<49x128xf32>
    %23 = arith.addf %20, %22 : vector<49x128xf32>
    %24 = arith.truncf %23 : vector<49x128xf32> to vector<49x128xbf16>
    %c0_12 = arith.constant 0 : index
    %c0_13 = arith.constant 0 : index
    %25 = vector.load %arg5[%c0_12, %c0_13] : memref<49x640xbf16, #tpu.memory_space<vmem>>, vector<49x128xbf16>
    tpu.vector_store %arg5[%c0_12, %c0_13], %24 {strides = array<i32>} : memref<49x640xbf16, #tpu.memory_space<vmem>>, vector<49x128xbf16>,
    %c0_14 = arith.constant 0 : index
    %c0_15 = arith.constant 0 : index
    %26 = vector.load %arg1[%c0_14, %c0_15] : memref<304x49xbf16, #tpu.memory_space<vmem>>, vector<304x49xbf16>
    %c0_16 = arith.constant 0 : index
    %c128 = arith.constant 128 : index
    %27 = vector.load %arg2[%c0_16, %c128] : memref<304x640xbf16, #tpu.memory_space<vmem>>, vector<304x128xbf16>
    %cst_17 = arith.constant dense<0.000000e+00> : vector<49x128xf32>
    %28 = tpu.matmul %26, %27, %cst_17 {dimension_numbers = #tpu.dot_dimension_numbers<[0], [0], [1], [1], [0, 1, 1, 1], [], []>} : vector<304x49xbf16>, vector<304x128xbf16>, vector<49x128xf32> -> vector<49x128xf32>
    %cst_18 = arith.constant dense<0.000000e+00> : vector<128xf32>
    %29 = vector.multi_reduction <add>, %28, %cst_18 [0] : vector<49x128xf32> to vector<128xf32>
    %30 = vector.shape_cast %29 : vector<128xf32> to vector<1x128xf32>
    %cst_19 = arith.constant 0.0204081628 : f32
    %31 = vector.broadcast %cst_19 : f32 to vector<1x128xf32>
    %32 = arith.mulf %30, %31 : vector<1x128xf32>
    %33 = vector.broadcast %32 : vector<1x128xf32> to vector<49x128xf32>
    %34 = arith.subf %28, %33 : vector<49x128xf32>
    %35 = arith.mulf %34, %34 : vector<49x128xf32>
    %cst_20 = arith.constant dense<0.000000e+00> : vector<128xf32>
    %36 = vector.multi_reduction <add>, %35, %cst_20 [0] : vector<49x128xf32> to vector<128xf32>
    %37 = vector.shape_cast %36 : vector<128xf32> to vector<1x128xf32>
    %cst_21 = arith.constant 0.0204081628 : f32
    %38 = vector.broadcast %cst_21 : f32 to vector<1x128xf32>
    %39 = arith.mulf %37, %38 : vector<1x128xf32>
    %c0_22 = arith.constant 0 : index
    %c128_23 = arith.constant 128 : index
    %40 = vector.load %arg3[%c0_22, %c128_23] : memref<1x640xf32, #tpu.memory_space<vmem>>, vector<1x128xf32>
    %cst_24 = arith.constant 1.000000e-03 : f32
    %41 = vector.broadcast %cst_24 : f32 to vector<1x128xf32>
    %42 = arith.addf %39, %41 : vector<1x128xf32>
    %43 = math.rsqrt %42 : vector<1x128xf32>
    %44 = arith.mulf %40, %43 : vector<1x128xf32>
    %45 = vector.broadcast %44 : vector<1x128xf32> to vector<49x128xf32>
    %46 = arith.mulf %34, %45 : vector<49x128xf32>
    %c0_25 = arith.constant 0 : index
    %c128_26 = arith.constant 128 : index
    %47 = vector.load %arg4[%c0_25, %c128_26] : memref<1x640xf32, #tpu.memory_space<vmem>>, vector<1x128xf32>
    %48 = vector.broadcast %47 : vector<1x128xf32> to vector<49x128xf32>
    %49 = arith.addf %46, %48 : vector<49x128xf32>
    %50 = arith.truncf %49 : vector<49x128xf32> to vector<49x128xbf16>
    %c0_27 = arith.constant 0 : index
    %c128_28 = arith.constant 128 : index
    %51 = vector.load %arg5[%c0_27, %c128_28] : memref<49x640xbf16, #tpu.memory_space<vmem>>, vector<49x128xbf16>
    tpu.vector_store %arg5[%c0_27, %c128_28], %50 {strides = array<i32>} : memref<49x640xbf16, #tpu.memory_space<vmem>>, vector<49x128xbf16>,
    %c0_29 = arith.constant 0 : index
    %c0_30 = arith.constant 0 : index
    %52 = vector.load %arg1[%c0_29, %c0_30] : memref<304x49xbf16, #tpu.memory_space<vmem>>, vector<304x49xbf16>
    %c0_31 = arith.constant 0 : index
    %c256 = arith.constant 256 : index
    %53 = vector.load %arg2[%c0_31, %c256] : memref<304x640xbf16, #tpu.memory_space<vmem>>, vector<304x128xbf16>
    %cst_32 = arith.constant dense<0.000000e+00> : vector<49x128xf32>
    %54 = tpu.matmul %52, %53, %cst_32 {dimension_numbers = #tpu.dot_dimension_numbers<[0], [0], [1], [1], [0, 1, 1, 1], [], []>} : vector<304x49xbf16>, vector<304x128xbf16>, vector<49x128xf32> -> vector<49x128xf32>
    %cst_33 = arith.constant dense<0.000000e+00> : vector<128xf32>
    %55 = vector.multi_reduction <add>, %54, %cst_33 [0] : vector<49x128xf32> to vector<128xf32>
    %56 = vector.shape_cast %55 : vector<128xf32> to vector<1x128xf32>
    %cst_34 = arith.constant 0.0204081628 : f32
    %57 = vector.broadcast %cst_34 : f32 to vector<1x128xf32>
    %58 = arith.mulf %56, %57 : vector<1x128xf32>
    %59 = vector.broadcast %58 : vector<1x128xf32> to vector<49x128xf32>
    %60 = arith.subf %54, %59 : vector<49x128xf32>
    %61 = arith.mulf %60, %60 : vector<49x128xf32>
    %cst_35 = arith.constant dense<0.000000e+00> : vector<128xf32>
    %62 = vector.multi_reduction <add>, %61, %cst_35 [0] : vector<49x128xf32> to vector<128xf32>
    %63 = vector.shape_cast %62 : vector<128xf32> to vector<1x128xf32>
    %cst_36 = arith.constant 0.0204081628 : f32
    %64 = vector.broadcast %cst_36 : f32 to vector<1x128xf32>
    %65 = arith.mulf %63, %64 : vector<1x128xf32>
    %c0_37 = arith.constant 0 : index
    %c256_38 = arith.constant 256 : index
    %66 = vector.load %arg3[%c0_37, %c256_38] : memref<1x640xf32, #tpu.memory_space<vmem>>, vector<1x128xf32>
    %cst_39 = arith.constant 1.000000e-03 : f32
    %67 = vector.broadcast %cst_39 : f32 to vector<1x128xf32>
    %68 = arith.addf %65, %67 : vector<1x128xf32>
    %69 = math.rsqrt %68 : vector<1x128xf32>
    %70 = arith.mulf %66, %69 : vector<1x128xf32>
    %71 = vector.broadcast %70 : vector<1x128xf32> to vector<49x128xf32>
    %72 = arith.mulf %60, %71 : vector<49x128xf32>
    %c0_40 = arith.constant 0 : index
    %c256_41 = arith.constant 256 : index
    %73 = vector.load %arg4[%c0_40, %c256_41] : memref<1x640xf32, #tpu.memory_space<vmem>>, vector<1x128xf32>
    %74 = vector.broadcast %73 : vector<1x128xf32> to vector<49x128xf32>
    %75 = arith.addf %72, %74 : vector<49x128xf32>
    %76 = arith.truncf %75 : vector<49x128xf32> to vector<49x128xbf16>
    %c0_42 = arith.constant 0 : index
    %c256_43 = arith.constant 256 : index
    %77 = vector.load %arg5[%c0_42, %c256_43] : memref<49x640xbf16, #tpu.memory_space<vmem>>, vector<49x128xbf16>
    tpu.vector_store %arg5[%c0_42, %c256_43], %76 {strides = array<i32>} : memref<49x640xbf16, #tpu.memory_space<vmem>>, vector<49x128xbf16>,
    %c0_44 = arith.constant 0 : index
    %c0_45 = arith.constant 0 : index
    %78 = vector.load %arg1[%c0_44, %c0_45] : memref<304x49xbf16, #tpu.memory_space<vmem>>, vector<304x49xbf16>
    %c0_46 = arith.constant 0 : index
    %c384 = arith.constant 384 : index
    %79 = vector.load %arg2[%c0_46, %c384] : memref<304x640xbf16, #tpu.memory_space<vmem>>, vector<304x128xbf16>
    %cst_47 = arith.constant dense<0.000000e+00> : vector<49x128xf32>
    %80 = tpu.matmul %78, %79, %cst_47 {dimension_numbers = #tpu.dot_dimension_numbers<[0], [0], [1], [1], [0, 1, 1, 1], [], []>} : vector<304x49xbf16>, vector<304x128xbf16>, vector<49x128xf32> -> vector<49x128xf32>
    %cst_48 = arith.constant dense<0.000000e+00> : vector<128xf32>
    %81 = vector.multi_reduction <add>, %80, %cst_48 [0] : vector<49x128xf32> to vector<128xf32>
    %82 = vector.shape_cast %81 : vector<128xf32> to vector<1x128xf32>
    %cst_49 = arith.constant 0.0204081628 : f32
    %83 = vector.broadcast %cst_49 : f32 to vector<1x128xf32>
    %84 = arith.mulf %82, %83 : vector<1x128xf32>
    %85 = vector.broadcast %84 : vector<1x128xf32> to vector<49x128xf32>
    %86 = arith.subf %80, %85 : vector<49x128xf32>
    %87 = arith.mulf %86, %86 : vector<49x128xf32>
    %cst_50 = arith.constant dense<0.000000e+00> : vector<128xf32>
    %88 = vector.multi_reduction <add>, %87, %cst_50 [0] : vector<49x128xf32> to vector<128xf32>
    %89 = vector.shape_cast %88 : vector<128xf32> to vector<1x128xf32>
    %cst_51 = arith.constant 0.0204081628 : f32
    %90 = vector.broadcast %cst_51 : f32 to vector<1x128xf32>
    %91 = arith.mulf %89, %90 : vector<1x128xf32>
    %c0_52 = arith.constant 0 : index
    %c384_53 = arith.constant 384 : index
    %92 = vector.load %arg3[%c0_52, %c384_53] : memref<1x640xf32, #tpu.memory_space<vmem>>, vector<1x128xf32>
    %cst_54 = arith.constant 1.000000e-03 : f32
    %93 = vector.broadcast %cst_54 : f32 to vector<1x128xf32>
    %94 = arith.addf %91, %93 : vector<1x128xf32>
    %95 = math.rsqrt %94 : vector<1x128xf32>
    %96 = arith.mulf %92, %95 : vector<1x128xf32>
    %97 = vector.broadcast %96 : vector<1x128xf32> to vector<49x128xf32>
    %98 = arith.mulf %86, %97 : vector<49x128xf32>
    %c0_55 = arith.constant 0 : index
    %c384_56 = arith.constant 384 : index
    %99 = vector.load %arg4[%c0_55, %c384_56] : memref<1x640xf32, #tpu.memory_space<vmem>>, vector<1x128xf32>
    %100 = vector.broadcast %99 : vector<1x128xf32> to vector<49x128xf32>
    %101 = arith.addf %98, %100 : vector<49x128xf32>
    %102 = arith.truncf %101 : vector<49x128xf32> to vector<49x128xbf16>
    %c0_57 = arith.constant 0 : index
    %c384_58 = arith.constant 384 : index
    %103 = vector.load %arg5[%c0_57, %c384_58] : memref<49x640xbf16, #tpu.memory_space<vmem>>, vector<49x128xbf16>
    tpu.vector_store %arg5[%c0_57, %c384_58], %102 {strides = array<i32>} : memref<49x640xbf16, #tpu.memory_space<vmem>>, vector<49x128xbf16>,
    %c0_59 = arith.constant 0 : index
    %c0_60 = arith.constant 0 : index
    %104 = vector.load %arg1[%c0_59, %c0_60] : memref<304x49xbf16, #tpu.memory_space<vmem>>, vector<304x49xbf16>
    %c0_61 = arith.constant 0 : index
    %c512 = arith.constant 512 : index
    %105 = vector.load %arg2[%c0_61, %c512] : memref<304x640xbf16, #tpu.memory_space<vmem>>, vector<304x128xbf16>
    %cst_62 = arith.constant dense<0.000000e+00> : vector<49x128xf32>
    %106 = tpu.matmul %104, %105, %cst_62 {dimension_numbers = #tpu.dot_dimension_numbers<[0], [0], [1], [1], [0, 1, 1, 1], [], []>} : vector<304x49xbf16>, vector<304x128xbf16>, vector<49x128xf32> -> vector<49x128xf32>
    %cst_63 = arith.constant dense<0.000000e+00> : vector<128xf32>
    %107 = vector.multi_reduction <add>, %106, %cst_63 [0] : vector<49x128xf32> to vector<128xf32>
    %108 = vector.shape_cast %107 : vector<128xf32> to vector<1x128xf32>
    %cst_64 = arith.constant 0.0204081628 : f32
    %109 = vector.broadcast %cst_64 : f32 to vector<1x128xf32>
    %110 = arith.mulf %108, %109 : vector<1x128xf32>
    %111 = vector.broadcast %110 : vector<1x128xf32> to vector<49x128xf32>
    %112 = arith.subf %106, %111 : vector<49x128xf32>
    %113 = arith.mulf %112, %112 : vector<49x128xf32>
    %cst_65 = arith.constant dense<0.000000e+00> : vector<128xf32>
    %114 = vector.multi_reduction <add>, %113, %cst_65 [0] : vector<49x128xf32> to vector<128xf32>
    %115 = vector.shape_cast %114 : vector<128xf32> to vector<1x128xf32>
    %cst_66 = arith.constant 0.0204081628 : f32
    %116 = vector.broadcast %cst_66 : f32 to vector<1x128xf32>
    %117 = arith.mulf %115, %116 : vector<1x128xf32>
    %c0_67 = arith.constant 0 : index
    %c512_68 = arith.constant 512 : index
    %118 = vector.load %arg3[%c0_67, %c512_68] : memref<1x640xf32, #tpu.memory_space<vmem>>, vector<1x128xf32>
    %cst_69 = arith.constant 1.000000e-03 : f32
    %119 = vector.broadcast %cst_69 : f32 to vector<1x128xf32>
    %120 = arith.addf %117, %119 : vector<1x128xf32>
    %121 = math.rsqrt %120 : vector<1x128xf32>
    %122 = arith.mulf %118, %121 : vector<1x128xf32>
    %123 = vector.broadcast %122 : vector<1x128xf32> to vector<49x128xf32>
    %124 = arith.mulf %112, %123 : vector<49x128xf32>
    %c0_70 = arith.constant 0 : index
    %c512_71 = arith.constant 512 : index
    %125 = vector.load %arg4[%c0_70, %c512_71] : memref<1x640xf32, #tpu.memory_space<vmem>>, vector<1x128xf32>
    %126 = vector.broadcast %125 : vector<1x128xf32> to vector<49x128xf32>
    %127 = arith.addf %124, %126 : vector<49x128xf32>
    %128 = arith.truncf %127 : vector<49x128xf32> to vector<49x128xbf16>
    %c0_72 = arith.constant 0 : index
    %c512_73 = arith.constant 512 : index
    %129 = vector.load %arg5[%c0_72, %c512_73] : memref<49x640xbf16, #tpu.memory_space<vmem>>, vector<49x128xbf16>
    tpu.vector_store %arg5[%c0_72, %c512_73], %128 {strides = array<i32>} : memref<49x640xbf16, #tpu.memory_space<vmem>>, vector<49x128xbf16>,
    return
  }
  func.func @transform_0(%arg0: i32) -> (i32, i32) {
    %c0_i32 = arith.constant 0 : i32
    %c0_i32_0 = arith.constant 0 : i32
    %c0_i32_1 = arith.constant 0 : i32
    return %c0_i32, %c0_i32_0 : i32, i32
  }
  func.func @transform_1(%arg0: i32) -> (i32, i32) {
    %c0_i32 = arith.constant 0 : i32
    %c0_i32_0 = arith.constant 0 : i32
    return %c0_i32, %arg0 : i32, i32
  }
  func.func @transform_2(%arg0: i32) -> (i32, i32) {
    %c0_i32 = arith.constant 0 : i32
    %c0_i32_0 = arith.constant 0 : i32
    return %c0_i32, %arg0 : i32, i32
  }
  func.func @transform_3(%arg0: i32) -> (i32, i32) {
    %c0_i32 = arith.constant 0 : i32
    %c0_i32_0 = arith.constant 0 : i32
    return %c0_i32, %arg0 : i32, i32
  }
  func.func @transform_4(%arg0: i32) -> (i32, i32) {
    %c0_i32 = arith.constant 0 : i32
    %c0_i32_0 = arith.constant 0 : i32
    return %c0_i32, %arg0 : i32, i32
  }
}

</mosaic_0001>

<bundles_post_ra>
// kernel: conv1x1_batchnorm.1
= control target key start
LH: loop header
LB: loop body
LE: loop exit
PB: predicated region body
PF: predicated region fallthrough
CT: control target
= control target key end

     0   :  { %s5509_s0 = inlined_call_operand.vmem [shape: bf16[304,49], index: 0, kind: input, shape index: {}]   ;;  %s5510_s1 = inlined_call_operand.hbm [shape: bf16[304,1920], index: 1, kind: input, shape index: {}]   ;;  %s5511_s2 = inlined_call_operand.hbm [shape: f32[1,1920], index: 2, kind: input, shape index: {}]   ;;  %s5512_s3 = inlined_call_operand.hbm [shape: f32[1,1920], index: 3, kind: input, shape index: {}]   ;;  %s5513_s4 = inlined_call_operand.vmem [shape: bf16[49,1920], index: 4, kind: output, shape index: {}]  }
   0x1   :  { %5517 = sst [smem:[#allocation10_spill]] %s5510_s1 }
   0x2   :  { %9 = vsyncpa [#allocation3], 0 }
   0x3   :  { %11 = vsyncpa [#allocation3 + $0x1], 0 }
   0x4   :  { %12 = vsyncpa [#allocation5], 0 }
   0x5   :  { %14 = vsyncpa [#allocation5 + $0x1], 0  ;;  %s4533_s15 = smov 0   ;;  %s4535_s16 = smov 0  }
   0x6   :  { %s4537_s17 = smov 0   ;;  %s4539_s18 = smov 0  }
   0x7 LB: > { %s4552_s19 = sadd.s32 4294967295, %s4500_s18   ;;  %s4555_s20 = sadd.s32 1, %s4500_s18   ;;  %s4500_s18 = sphi %s4539_s18, %s5534_s18   ;;  %s4496_s17 = sphi %s4537_s17, %s5533_s17   ;;  %s4492_s16 = sphi %s4535_s16, %s5532_s16   ;;  %s4488_s15 = sphi %s4533_s15, %s5531_s15  }
   0x8   : > { %s45_s21 = ssub.s32 %s4500_s18, %s4555_s20  ;;  %s48_s22 = sadd.s32 1, %s4496_s17 }
   0x9   : > { %p46_p0 = scmp.eq.s32.totalorder %s45_s21, 0  ;;  %p55_p1 = scmp.ne.s32.totalorder %s4496_s17, %s4492_s16 }
   0xa   : > { %p56_p2 = scmp.eq.s32.totalorder %s4500_s18, 0  ;;  %p61_p3 = scmp.ne.s32.totalorder %s4492_s16, %s4488_s15 }
   0xb   : > { %s4565_s23 = scalar_select %p46_p0, %s4496_s17, %s48_s22  }
   0xc   : > { %p57_p4 = por %p56_p2, %p55_p1  ;;  %p62_p5 = scmp.eq.s32.totalorder %s4552_s19, 0 }
   0xd   : > { %p137_p6 = scmp.eq.s32.totalorder %s4552_s19, 2  ;;  %p4135_p8 = scmp.lt.s32.totalorder %s4500_s18, 3 }
   0xe   : > { %p4569_p7 = por %p62_p5, %p61_p3  ;;  %s4579_s26 = sand.u32 1, %s4496_s17  }
   0xf   : > { %p4574_p9 = por %p137_p6, %p55_p1  ;;  %s4113_s27 = smul.u32 760, %s4579_s26 }
  0x10   : > { %s5518_s24 = scalar_select %p4569_p7, 1, 0 }
  0x11   : > { %s5519_s25 = scalar_select %p4574_p9, 1, 0 }
  0x12   : > { %p4582_p10 = pnand %p4135_p8, %p57_p4  ;;  %s187_s29 = sand.u32 1, %s4500_s18  }
  0x13   : > { %s170_s30 = scalar_lea.vmem [#allocation2], %s4113_s27  ;;  %s5515_s6 = smul.u32 5, %s4579_s26 }
  0x14   : > { %s5520_s28 = scalar_select %p4582_p10, 1, 0 }
  0x15   : > { %s177_s5 = sshll.u32 %s170_s30, 4  ;;  %s3770_s7 = smul.u32 80, %s4500_s18  ;;  %s4587_s5 = int_to_ptr.vmem [resolvable:$true] %s177_s5 }
  0x16   : > { %p3501_p11 = scmp.ge.s32.totalorder %s4500_s18, 1  ;;  %p223_p12 = scmp.lt.s32.totalorder %s4500_s18, 4 }
  0x17   : > { %s4598_s10 = scalar_lea.hbm %s5511_s2, %s3770_s7  ;;  %s191_s11 = scalar_lea.vmem [#allocation4], %s5515_s6 }
  0x18   : > { %s199_s12 = sshll.u32 %s191_s11, 4  ;;  %p4604_p13 = pnand %p3501_p11, %p223_p12  ;;  %s4602_s12 = int_to_ptr.vmem [resolvable:$true] %s199_s12 }
  0x19   : > { %s4608_s14 = scalar_lea.sflag [#allocation5], %s187_s29  ;;  %s4372_s15 = scalar_lea.hbm %s4598_s10, 80 }
  0x1a   : > { %s5521_s13 = scalar_select %p4604_p13, 1, 0 }
  0x1b   : > { %p4373_p0 = scmp.ne.s32.totalorder %s4598_s10, %s4372_s15  ;;  %p4614_p1 = pneg %p4582_p10 }
  0x1c   : > { %s4377_s30 = scalar_lea.hbm %s5511_s2, 240  ;;  %p4378_p4 = scmp.lt.u32.totalorder %s4598_s10, %s5511_s2 }
  0x1d   : > { %p4375_p2 = pnand %p4614_p1, %p4373_p0  ;;  %p4379_p5 = scmp.lt.u32.totalorder %s4377_s30, %s4372_s15 }
  0x1e   : > { %p4381_p8 = scmp.lt.u32.totalorder %s4372_s15, %s4598_s10 }
  0x1f   : > { %p4376_p3 = pneg %p4375_p2  ;;  %p4380_p6 = por %p4379_p5, %p4378_p4 }
  0x21   : > { %p4382_p11 = por %p4381_p8, %p4380_p6 }
  0x23   : > { %p4383_p12 = pnand %p4382_p11, %p4376_p3 }
  0x25   : > { %4386 = shalt.err (!%p4383_p12)
}
  0x26   : > { %s4387_s29 = scalar_lea.vmem %s4602_s12, 80  ;;  %s4502_s11 = smov [#allocation4]  }
  0x27   : > { %p4388_p0 = scmp.ne.s32.totalorder %s4602_s12, %s4387_s29  ;;  %s4392_s22 = sshll.u32 %s4502_s11, 4  ;;  %s4393_s22 = int_to_ptr.vmem [resolvable:$false] %s4392_s22 }
  0x28   : > { %s4394_s27 = scalar_lea.vmem %s4393_s22, 160  ;;  %p4395_p7 = scmp.lt.s32.totalorder %s4602_s12, %s4393_s22 }
  0x29   : > { %p4390_p2 = pnand %p4388_p0, %p4614_p1  ;;  %p4396_p13 = scmp.lt.s32.totalorder %s4394_s27, %s4387_s29 }
  0x2b   : > { %p4391_p9 = pneg %p4390_p2  ;;  %p4397_p4 = por %p4396_p13, %p4395_p7 }
  0x2d   : > { %p4398_p5 = pnand %p4397_p4, %p4391_p9 }
  0x2f   : > { %4401 = shalt.err (!%p4398_p5)
}
  0x30   : > { %4131 = dma.hbm_to_vmem [thread:$0]  (!%p4582_p10), %s4598_s10, 80, %s4602_s12, %s4608_s14  }
  0x31   : > { %s3769_s15 = smul.u32 320, %s4500_s18  ;;  %s5523_s1 = sld [smem:[#allocation10_spill]] }
  0x32   : > { %s167_s29 = scalar_lea.sflag [#allocation3], %s4579_s26 }
  0x37   : > { %s4642_s9 = scalar_lea.hbm %s5523_s1, %s3769_s15  ;;  %s4407_s10 = scalar_lea.hbm %s5523_s1, 36480 }
  0x38   : > { %s4402_s11 = scalar_lea.hbm %s4642_s9, 12160  ;;  %p4408_p3 = scmp.lt.u32.totalorder %s4642_s9, %s5523_s1 }
  0x39   : > { %p4403_p7 = scmp.ne.s32.totalorder %s4642_s9, %s4402_s11  ;;  %p4409_p6 = scmp.lt.u32.totalorder %s4407_s10, %s4402_s11 }
  0x3a   : > { %p4411_p11 = scmp.lt.u32.totalorder %s4402_s11, %s4642_s9 }
  0x3b   : > { %p4405_p9 = pnand %p4403_p7, %p4614_p1  ;;  %p4410_p8 = por %p4409_p6, %p4408_p3 }
  0x3d   : > { %p4406_p13 = pneg %p4405_p9  ;;  %p4412_p12 = por %p4411_p11, %p4410_p8 }
  0x3f   : > { %p4413_p0 = pnand %p4412_p12, %p4406_p13 }
  0x41   : > { %4416 = shalt.err (!%p4413_p0)
}
  0x42   : > { %s4417_s15 = scalar_lea.vmem %s4587_s5, 12160  ;;  %s4503_s30 = smov [#allocation2]  }
  0x43   : > { %p4418_p2 = scmp.ne.s32.totalorder %s4587_s5, %s4417_s15  ;;  %s4422_s8 = sshll.u32 %s4503_s30, 4  ;;  %s4423_s8 = int_to_ptr.vmem [resolvable:$false] %s4422_s8 }
  0x44   : > { %s4424_s6 = scalar_lea.vmem %s4423_s8, 24320  ;;  %p4425_p7 = scmp.lt.s32.totalorder %s4587_s5, %s4423_s8 }
  0x45   : > { %p4420_p4 = pnand %p4418_p2, %p4614_p1  ;;  %p4426_p9 = scmp.lt.s32.totalorder %s4424_s6, %s4417_s15 }
  0x47   : > { %p4421_p5 = pneg %p4420_p4  ;;  %p4427_p3 = por %p4426_p9, %p4425_p7 }
  0x49   : > { %p4428_p6 = pnand %p4427_p3, %p4421_p5 }
  0x4b   : > { %4431 = shalt.err (!%p4428_p6)
}
  0x4c   : > { %s4504_s11 = smov 960   ;;  %s4505_s22 = smov 320  }
  0x4d   : > { %s4506_s27 = smov 20   ;;  %s4673_s15 = scalar_lea.hbm %s5512_s3, %s3770_s7 }
  0x4e   : > { %4128 = dma.hbm_to_vmem [thread:$0]  (!%p4582_p10), %s4642_s9, 12160, %s4587_s5, %s167_s29, %s4504_s11, %s4505_s22, %s4506_s27  }
  0x4f   : > { %s5524_s30 = smul.u32 5, %s4579_s26  ;;  %s4432_s1 = scalar_lea.hbm %s4673_s15, 80 }
  0x50   : > { %p4433_p13 = scmp.ne.s32.totalorder %s4673_s15, %s4432_s1  ;;  %s4437_s9 = scalar_lea.hbm %s5512_s3, 240 }
  0x51   : > { %s210_s8 = scalar_lea.vmem [#allocation6], %s5524_s30  ;;  %p4438_p12 = scmp.lt.u32.totalorder %s4673_s15, %s5512_s3 }
  0x52   : > { %s218_s6 = sshll.u32 %s210_s8, 4  ;;  %p4435_p8 = pnand %p4433_p13, %p4614_p1  ;;  %s219_s6 = int_to_ptr.vmem [resolvable:$true] %s218_s6 }
  0x53   : > { %p4439_p0 = scmp.lt.u32.totalorder %s4437_s9, %s4432_s1  ;;  %p4441_p4 = scmp.lt.u32.totalorder %s4432_s1, %s4673_s15 }
  0x54   : > { %p4436_p11 = pneg %p4435_p8 }
  0x55   : > { %p4440_p2 = por %p4439_p0, %p4438_p12 }
  0x57   : > { %p4442_p5 = por %p4441_p4, %p4440_p2 }
  0x59   : > { %p4443_p7 = pnand %p4442_p5, %p4436_p11 }
  0x5b   : > { %4446 = shalt.err (!%p4443_p7)
}
  0x5c   : > { %s4447_s26 = scalar_lea.vmem %s219_s6, 80  ;;  %s4507_s11 = smov [#allocation6]  }
  0x5d   : > { %p4448_p9 = scmp.ne.s32.totalorder %s219_s6, %s4447_s26  ;;  %s4452_s22 = sshll.u32 %s4507_s11, 4  ;;  %s4453_s22 = int_to_ptr.vmem [resolvable:$false] %s4452_s22 }
  0x5e   : > { %s4454_s27 = scalar_lea.vmem %s4453_s22, 160  ;;  %p4455_p13 = scmp.lt.s32.totalorder %s219_s6, %s4453_s22 }
  0x5f   : > { %p4450_p3 = pnand %p4448_p9, %p4614_p1  ;;  %p4456_p8 = scmp.lt.s32.totalorder %s4454_s27, %s4447_s26 }
  0x61   : > { %p4451_p6 = pneg %p4450_p3  ;;  %p4457_p10 = por %p4456_p8, %p4455_p13 }
  0x63   : > { %p4458_p0 = pnand %p4457_p10, %p4451_p6 }
  0x65   : > { %4461 = shalt.err (!%p4458_p0)
}
  0x66   : > { %p5525_p12 = scmp.ne.s32.totalorder %s5520_s28, 0  ;;  %p5526_p11 = scmp.ne.s32.totalorder %s5521_s13, 0 }
  0x67   : > { %s4698_s1 = sand.u32 (!%p5526_p11), 1, %s4492_s16   ;;  %p5527_p10 = scmp.ne.s32.totalorder (!%p5526_p11), %s5518_s24, 0 }
  0x68   : > { %4134 = dma.hbm_to_vmem [thread:$0]  (!%p5525_p12), %s4673_s15, 80, %s219_s6, %s4608_s14  }
  0x69   : > { %227 = sbr.rel (%p5526_p11) target bundleno = 726 (0x2d6), region = 36  ;;  %s230_s10 = scalar_lea.sflag (!%p5526_p11), [#allocation3], %s4698_s1 }
  0x6a   : > { %s4116_s21 = smul.u32 (!%p5526_p11), 760, %s4698_s1 }
  0x6c   : > { %s4702_s12 = scalar_lea.vmem (!%p5526_p11), [#allocation2], %s4116_s21 }
  0x70   : > { %4479 = dma.done.wait (%p5527_p10), %s230_s10, 12160  }
  0x71   : > { %4481 = vsyncadd (%p5527_p10), %s230_s10, 4294955136  ;;  %s238_s28 = sand.u32 1, %s4552_s19   ;;  %s4117_s13 = smul.u32 5, %s4698_s1 }
  0x72   : > { %s239_s14 = scalar_lea.sflag [#allocation5], %s238_s28 }
  0x73   : > { %s4712_s15 = scalar_lea.vmem [#allocation4], %s4117_s13 }
  0x74   : > { %4483 = dma.done.wait (%p5527_p10), %s239_s14, 160  }
  0x75   : > { %4485 = vsyncadd (%p5527_p10), %s239_s14, 4294967136  ;;  %v4172_v0 = vld [vmem:[%s5509_s0 + $0x80] sm:$0xff]   ;;  %v4174_v2 = vld [vmem:[%s5509_s0 + $0x88] sm:$0xff]   ;;  %vm642_vm0 = vcmask 392192   ;;  %vm788_vm1 = vcmask 1040384   ;;  %s5202_s5 = scalar_lea.vmem [#allocation6], %s4117_s13 }
  0x76   : > { %v4173_v1 = vld [vmem:[%s5509_s0 + $0x40] sm:$0xff]   ;;  %512 = vxpose.xlu0.c.b16.start [1/3] (short) (narrow) %v4172_v0, 64  ;;  %v4175_v3 = vld [vmem:[%s5509_s0 + $0x48] sm:$0xff]   ;;  %v4176_v4 = vld [vmem:[%s5509_s0 + $0x90] sm:$0xff]   ;;  %vm893_vm2 = vsmask.f32 256 }
  0x77   : > { %496 = vxpose.xlu1.c.b16.start [1/8] (narrow) %v4173_v1, 64  ;;  %v4177_v5 = vld [vmem:[%s5509_s0 + $0x50] sm:$0xff]   ;;  %v4178_v6 = vld [vmem:[%s5509_s0 + $0x58] sm:$0xff]   ;;  %v4179_v7 = vld [vmem:[%s5509_s0] sm:$0xff]   ;;  %p5530_p1 = scmp.ne.s32.totalorder %s5519_s25, 0 }
  0x78   : > { %v4180_v8 = vld [vmem:[%s5509_s0 + $0x60] sm:$0xff]   ;;  %v4181_v9 = vld [vmem:[%s5509_s0 + $0x8] sm:$0xff]   ;;  %v4183_v11 = vld [vmem:[%s5509_s0 + $0x10] sm:$0xff]  }
  0x79   : > { %v4182_v10 = vld [vmem:[%s5509_s0 + $0x68] sm:$0xff]   ;;  %v4184_v12 = vld [vmem:[%s5509_s0 + $0x70] sm:$0xff]   ;;  %v4185_v13 = vld [vmem:[%s5509_s0 + $0x18] sm:$0xff]  }
  0x7a   : > { %513 = vxpose.xlu0.c.b16.cont [2/3] (short) (narrow) %v4174_v2, 64  ;;  %v4186_v14 = vld [vmem:[%s5509_s0 + $0x78] sm:$0xff]   ;;  %v4187_v15 = vld [vmem:[%s5509_s0 + $0x20] sm:$0xff]   ;;  %v4189_v17 = vld [vmem:[%s5509_s0 + $0x28] sm:$0xff]  }
  0x7b   : > { %497 = vxpose.xlu1.c.b16.cont [2/8] (narrow) %v4175_v3, 64  ;;  %v4188_v16 = vld [vmem:[%s5509_s0 + $0x40] sm:$0xff]   ;;  %v4190_v18 = vld [vmem:[%s5509_s0 + $0x48] sm:$0xff]   ;;  %v4191_v19 = vld [vmem:[%s5509_s0 + $0x30] sm:$0xff]  }
  0x7c   : > { %v4192_v20 = vld [vmem:[%s5509_s0 + $0x50] sm:$0xff]   ;;  %v4193_v21 = vld [vmem:[%s5509_s0 + $0x38] sm:$0xff]   ;;  %v4195_v23 = vld [vmem:[%s5509_s0] sm:$0xff]  }
  0x7d   : > { %v4194_v22 = vld [vmem:[%s5509_s0 + $0x58] sm:$0xff]   ;;  %v4196_v26 = vld [vmem:[%s5509_s0 + $0x60] sm:$0xff]   ;;  %v4197_v27 = vld [vmem:[%s5509_s0 + $0x8] sm:$0xff]  }
  0x7e   : > { %514 = vxpose.xlu0.c.b16.end [3/3] (short) (narrow) %v4176_v4, 64  ;;  %v4216_v24 = vld [vmem:[%s4702_s12 + $0x140] ss:$20 sps:$4 sm:$0xff]   ;;  %v4220_v28 = vld [vmem:[%s4702_s12 + $0x168] ss:$20 sps:$4 sm:$0xff]   ;;  %vm5217_vm3 = vmand %vm788_vm1, %vm893_vm2 }
  0x7f   : > { %498 = vxpose.xlu1.c.b16.cont [3/8] (narrow) %v4177_v5, 64  ;;  %v4217_v25 = vld [vmem:[%s4702_s12] ss:$20 sps:$4 sm:$0xff]   ;;  %3808 = vmatprep.subr.bf16.mxu0 %v4216_v24  ;;  %v4221_v29 = vld [vmem:[%s4702_s12 + $0x28] ss:$20 sps:$4 sm:$0xff]  }
  0x80   : > { %3809 = vmatpush3.bf16.msra.mxu0 %v4217_v25  ;;  %v4198_v30 = vld [vmem:[%s5509_s0 + $0x68] sm:$0xff]   ;;  %v4199_v31 = vld [vmem:[%s5509_s0 + $0x10] sm:$0xff]   ;;  %v4201_v35 = vld [vmem:[%s5509_s0 + $0x18] sm:$0xff]  }
  0x81   : > { %3810 = vmatprep.subr.bf16.mxu0 %v4220_v28  ;;  %v4224_v32 = vld [vmem:[%s4702_s12 + $0x190] ss:$20 sps:$4 sm:$0xff]   ;;  %v4228_v36 = vld [vmem:[%s4702_s12 + $0x1b8] ss:$20 sps:$4 sm:$0xff]   ;;  %v4232_v40 = vld [vmem:[%s4702_s12 + $0x1e0] ss:$20 sps:$4 sm:$0xff]  }
  0x82   : > { %v4225_v33 = vld [vmem:[%s4702_s12 + $0x50] ss:$20 sps:$4 sm:$0xff]   ;;  %v4229_v37 = vld [vmem:[%s4702_s12 + $0x78] ss:$20 sps:$4 sm:$0xff]   ;;  %v4233_v41 = vld [vmem:[%s4702_s12 + $0xa0] ss:$20 sps:$4 sm:$0xff]  }
  0x83   : > { %499 = vxpose.xlu1.c.b16.cont [4/8] (narrow) %v4178_v6, 64  ;;  %480 = vxpose.xlu0.c.b16.start [1/8] (narrow) %v4179_v7, 64  ;;  %v4200_v34 = vld [vmem:[%s5509_s0 + $0x70] sm:$0xff]   ;;  %v4202_v38 = vld [vmem:[%s5509_s0 + $0x78] sm:$0xff]   ;;  %v4203_v39 = vld [vmem:[%s5509_s0 + $0x20] sm:$0xff]  }
  0x84   : > { %3811 = vmatpush3.bf16.msra.mxu0 %v4221_v29  ;;  %v4204_v42 = vld [vmem:[%s5509_s0 + $0x80] sm:$0xff]   ;;  %v4205_v43 = vld [vmem:[%s5509_s0 + $0x28] sm:$0xff]   ;;  %v4207_v47 = vld [vmem:[%s5509_s0 + $0x30] sm:$0xff]  }
  0x85   : > { %3812 = vmatprep.subr.bf16.mxu0 %v4224_v32  ;;  %v4236_v44 = vld [vmem:[%s4702_s12 + $0x208] ss:$20 sps:$4 sm:$0xff]   ;;  %v4240_v50 = vld [vmem:[%s4702_s12 + $0x230] ss:$20 sps:$4 sm:$0xff]   ;;  %v4242_v52 = vld [vmem:[%s4702_s12 + $0x280] ss:$20 sps:$4 sm:$0xff]  }
  0x86   : > { %v4237_v45 = vld [vmem:[%s4702_s12 + $0xc8] ss:$20 sps:$4 sm:$0xff]   ;;  %v4241_v51 = vld [vmem:[%s4702_s12 + $0xf0] ss:$20 sps:$4 sm:$0xff]   ;;  %4043 = vmatprep.subr.bf16.mxu1 %v4242_v52  ;;  %v4245_v55 = vld [vmem:[%s4702_s12 + $0x258] ss:$20 sps:$4 sm:$0xff]  }
  0x87   : > { %500 = vxpose.xlu1.c.b16.cont [5/8] (narrow) %v4180_v8, 64  ;;  %481 = vxpose.xlu0.c.b16.cont [2/8] (narrow) %v4181_v9, 64  ;;  %v4206_v46 = vld [vmem:[%s5509_s0 + $0x88] sm:$0xff]   ;;  %v4208_v48 = vld [vmem:[%s5509_s0 + $0x90] sm:$0xff]   ;;  %v4209_v49 = vld [vmem:[%s5509_s0 + $0x38] sm:$0xff]  }
  0x88   : > { %3813 = vmatpush3.bf16.msra.mxu0 %v4225_v33  ;;  %v4210_v53 = vld [vmem:[%s5509_s0] sm:$0xff]   ;;  %4044 = vmatpush3.bf16.msra.mxu1 %v4242_v52  ;;  %v4212_v58 = vld [vmem:[%s5509_s0 + $0x8] sm:$0xff]   ;;  %v4214_v62 = vld [vmem:[%s5509_s0 + $0x10] sm:$0xff]  }
  0x89   : > { %3814 = vmatprep.subr.bf16.mxu0 %v4228_v36  ;;  %v4211_v54 = vld [vmem:[%s5509_s0 + $0x40] sm:$0xff]   ;;  %v4213_v59 = vld [vmem:[%s5509_s0 + $0x48] sm:$0xff]   ;;  %v4215_v63 = vld [vmem:[%s5509_s0 + $0x50] sm:$0xff]  }
  0x8a   : > { %v4246_v56 = vld [vmem:[%s4702_s12 + $0x118] ss:$20 sps:$4 sm:$0xff]   ;;  %v4247_v57 = vld [vmem:[%s4702_s12 + $0x2a8] ss:$20 sps:$4 sm:$0xff]   ;;  %v4250_v60 = vld [vmem:[%s4702_s12 + $0x2d0] ss:$20 sps:$4 sm:$0xff]  }
  0x8b   : > { %501 = vxpose.xlu1.c.b16.cont [6/8] (narrow) %v4182_v10, 64  ;;  %482 = vxpose.xlu0.c.b16.cont [3/8] (narrow) %v4183_v11, 64  ;;  %v4252_v61 = vld [vmem:[%s4702_s12 + $0x144] ss:$20 sps:$4 sm:$0xff]   ;;  %v4226_v4 = vld [vmem:[%s5509_s0 + $0x28] sm:$0xff]  }
  0x8c   : > { %3815 = vmatpush3.bf16.msra.mxu0 %v4229_v37  ;;  %4045 = vmatprep.subr.bf16.mxu1 %v4247_v57  ;;  %v4218_v0 = vld [vmem:[%s5509_s0 + $0x18] sm:$0xff]   ;;  %v4222_v2 = vld [vmem:[%s5509_s0 + $0x20] sm:$0xff]   ;;  %v4227_v5 = vld [vmem:[%s5509_s0 + $0x68] sm:$0xff]  }
  0x8d   : > { %3816 = vmatprep.subr.bf16.mxu0 %v4232_v40  ;;  %4046 = vmatpush3.bf16.msra.mxu1 %v4247_v57  ;;  %v4219_v1 = vld [vmem:[%s5509_s0 + $0x58] sm:$0xff]   ;;  %v4223_v3 = vld [vmem:[%s5509_s0 + $0x60] sm:$0xff]   ;;  %v4230_v6 = vld [vmem:[%s5509_s0 + $0x30] sm:$0xff]  }
  0x8e   : > { %4047 = vmatprep.subr.bf16.mxu1 %v4250_v60  ;;  %v4231_v7 = vld [vmem:[%s5509_s0 + $0x70] sm:$0xff]   ;;  %v4234_v8 = vld [vmem:[%s5509_s0 + $0x38] sm:$0xff]   ;;  %v4254_v33 = vld [vmem:[%s5509_s0] sm:$0xff]  }
  0x8f   : > { %502 = vxpose.xlu1.c.b16.cont [7/8] (narrow) %v4184_v12, 64  ;;  %483 = vxpose.xlu0.c.b16.cont [4/8] (narrow) %v4185_v13, 64  ;;  %v4235_v10 = vld [vmem:[%s5509_s0 + $0x78] sm:$0xff]   ;;  %v4238_v13 = vld [vmem:[%s5509_s0 + $0x80] sm:$0xff]   ;;  %v4248_v25 = vld [vmem:[%s5509_s0 + $0x90] sm:$0xff]  }
  0x90   : > { %3817 = vmatpush3.bf16.msra.mxu0 %v4233_v41  ;;  %v4253_v12 = vld [vmem:[%s4702_s12 + $0x4] ss:$20 sps:$4 sm:$0xff]   ;;  %v4265_v28 = vld [vmem:[%s4702_s12 + $0x7c] ss:$20 sps:$4 sm:$0xff]   ;;  %v4272_v36 = vld [vmem:[%s4702_s12 + $0x20c] ss:$20 sps:$4 sm:$0xff]  }
  0x91   : > { %3818 = vmatprep.subr.bf16.mxu0 %v4236_v44  ;;  %4048 = vmatpush3.bf16.msra.mxu1 %v4250_v60  ;;  %v4285_v24 = vld [vmem:[%s4702_s12 + $0x284] ss:$20 sps:$4 sm:$0xff]   ;;  %v4292_v37 = vld [vmem:[%s4702_s12 + $0x2d4] ss:$20 sps:$4 sm:$0xff]   ;;  %v4273_v40 = vld [vmem:[%s4702_s12 + $0xcc] ss:$20 sps:$4 sm:$0xff]  }
  0x92   : > { %3855 = vmatprep.subr.bf16.mxu1 %v4252_v61  ;;  %v4268_v29 = vld [vmem:[%s4702_s12 + $0x1e4] ss:$20 sps:$4 sm:$0xff]   ;;  %v4271_v57 = vld [vmem:[%s5509_s0 + $0x68] sm:$0xff]  }
  0x93   : > { %503 = vxpose.xlu1.c.b16.end [8/8] (narrow) %v4186_v14, 64  ;;  %484 = vxpose.xlu0.c.b16.cont [5/8] (narrow) %v4187_v15, 64  ;;  %v4256_v14 = vld [vmem:[%s4702_s12 + $0x16c] ss:$20 sps:$4 sm:$0xff]   ;;  %v4259_v44 = vld [vmem:[%s5509_s0 + $0x50] sm:$0xff]  }
  0x94   : > { %3819 = vmatpush3.bf16.msra.mxu0 %v4237_v45  ;;  %v4262_v45 = vld [vmem:[%s5509_s0 + $0x10] sm:$0xff]  }
  0x95   : > { %3820 = vmatprep.subr.bf16.mxu0 %v4240_v50  ;;  %v4281_v50 = vld [vmem:[%s4702_s12 + $0x11c] ss:$20 sps:$4 sm:$0xff]  }
  0x96   : > { %v4275_v60 = vld [vmem:[%s5509_s0 + $0x70] sm:$0xff]  }
  0x97   : > { %1104 = vxpose.xlu1.c.b16.start [1/8] (narrow) %v4188_v16, 64  ;;  %485 = vxpose.xlu0.c.b16.cont [6/8] (narrow) %v4189_v17, 64  ;;  %v4239_v16 = vld [vmem:[%s5509_s0 + $0x80] sm:$0xff]   ;;  %v4278_v61 = vld [vmem:[%s5509_s0 + $0x30] sm:$0xff]  }
  0x98   : > { %3821 = vmatpush3.bf16.msra.mxu0 %v4241_v51  ;;  %v4257_v17 = vld [vmem:[%s4702_s12 + $0x2c] ss:$20 sps:$4 sm:$0xff]  }
  0x99   : > { %3822 = vmatprep.subr.bf16.mxu0 %v4245_v55  ;;  %v4270_v55 = vld [vmem:[%s5509_s0 + $0x20] sm:$0xff]  }
  0x9b   : > { %1105 = vxpose.xlu1.c.b16.cont [2/8] (narrow) %v4190_v18, 64  ;;  %486 = vxpose.xlu0.c.b16.cont [7/8] (narrow) %v4191_v19, 64  ;;  %v4243_v18 = vld [vmem:[%s5509_s0 + $0x88] sm:$0xff]  }
  0x9c   : > { %3823 = vmatpush3.bf16.msra.mxu0 %v4246_v56  ;;  %v4260_v19 = vld [vmem:[%s4702_s12 + $0x194] ss:$20 sps:$4 sm:$0xff]  }
  0x9d   : > { %4057 = vmatprep.subr.bf16.mxu0 %v4285_v24 }
  0x9f   : > { %1106 = vxpose.xlu1.c.b16.cont [3/8] (narrow) %v4192_v20, 64  ;;  %487 = vxpose.xlu0.c.b16.end [8/8] (narrow) %v4193_v21, 64  ;;  %v4244_v21 = vld [vmem:[%s5509_s0 + $0x88] sm:$0xff]  }
  0xa3   : > { %1107 = vxpose.xlu1.c.b16.cont [4/8] (narrow) %v4194_v22, 64  ;;  %1088 = vxpose.xlu0.c.b16.start [1/8] (narrow) %v4195_v23, 64  ;;  %v4261_v22 = vld [vmem:[%s4702_s12 + $0x54] ss:$20 sps:$4 sm:$0xff]   ;;  %v4264_v23 = vld [vmem:[%s4702_s12 + $0x1bc] ss:$20 sps:$4 sm:$0xff]  }
  0xa7   : > { %1108 = vxpose.xlu1.c.b16.cont [5/8] (narrow) %v4196_v26, 64  ;;  %1089 = vxpose.xlu0.c.b16.cont [2/8] (narrow) %v4197_v27, 64  ;;  %v4249_v27 = vld [vmem:[%s5509_s0 + $0x90] sm:$0xff]  }
  0xab   : > { %1109 = vxpose.xlu1.c.b16.cont [6/8] (narrow) %v4198_v30, 64  ;;  %1090 = vxpose.xlu0.c.b16.cont [3/8] (narrow) %v4199_v31, 64  ;;  %v4251_v30 = vld [vmem:[%s5509_s0 + $0x40] sm:$0xff]  }
  0xaf   : > { %1110 = vxpose.xlu1.c.b16.cont [7/8] (narrow) %v4200_v34, 64  ;;  %1091 = vxpose.xlu0.c.b16.cont [4/8] (narrow) %v4201_v35, 64  ;;  %v4269_v34 = vld [vmem:[%s4702_s12 + $0xa4] ss:$20 sps:$4 sm:$0xff]   ;;  %v4287_v35 = vld [vmem:[%s4702_s12 + $0x2ac] ss:$20 sps:$4 sm:$0xff]  }
  0xb3   : > { %1111 = vxpose.xlu1.c.b16.end [8/8] (narrow) %v4202_v38, 64  ;;  %1092 = vxpose.xlu0.c.b16.cont [5/8] (narrow) %v4203_v39, 64  ;;  %v4255_v38 = vld [vmem:[%s5509_s0 + $0x48] sm:$0xff]  }
  0xb4   : > { %v4258_v39 = vld [vmem:[%s5509_s0 + $0x8] sm:$0xff]  }
  0xb7   : > { %1120 = vxpose.xlu1.c.b16.start [1/3] (short) (narrow) %v4204_v42, 64  ;;  %1093 = vxpose.xlu0.c.b16.cont [6/8] (narrow) %v4205_v43, 64  ;;  %v4276_v43 = vld [vmem:[%s4702_s12 + $0x234] ss:$20 sps:$4 sm:$0xff]  }
  0xbb   : > { %1121 = vxpose.xlu1.c.b16.cont [2/3] (short) (narrow) %v4206_v46, 64  ;;  %1094 = vxpose.xlu0.c.b16.cont [7/8] (narrow) %v4207_v47, 64  ;;  %v4277_v46 = vld [vmem:[%s4702_s12 + $0xf4] ss:$20 sps:$4 sm:$0xff]   ;;  %v4280_v47 = vld [vmem:[%s4702_s12 + $0x25c] ss:$20 sps:$4 sm:$0xff]  }
  0xbf   : > { %1122 = vxpose.xlu1.c.b16.end [3/3] (short) (narrow) %v4208_v48, 64  ;;  %1095 = vxpose.xlu0.c.b16.end [8/8] (narrow) %v4209_v49, 64  ;;  %v4263_v48 = vld [vmem:[%s5509_s0 + $0x58] sm:$0xff]  }
  0xc0   : > { %v4266_v49 = vld [vmem:[%s5509_s0 + $0x18] sm:$0xff]  }
  0xc3   : > { %1691 = vxpose.xlu0.c.b16.start [1/8] (narrow) %v4210_v53, 64  ;;  %v4288_v53 = vld [vmem:[%s4702_s12 + $0x148] ss:$20 sps:$4 sm:$0xff]  }
  0xc4   : > { %1707 = vxpose.xlu1.c.b16.start [1/8] (narrow) %v4211_v54, 64  ;;  %v4267_v54 = vld [vmem:[%s5509_s0 + $0x60] sm:$0xff]  }
  0xc7   : > { %1692 = vxpose.xlu0.c.b16.cont [2/8] (narrow) %v4212_v58, 64  ;;  %v4274_v58 = vld [vmem:[%s5509_s0 + $0x28] sm:$0xff]  }
  0xc8   : > { %1708 = vxpose.xlu1.c.b16.cont [2/8] (narrow) %v4213_v59, 64 }
  0xcb   : > { %1693 = vxpose.xlu0.c.b16.cont [3/8] (narrow) %v4214_v62, 64  ;;  %v4290_v62 = vld [vmem:[%s4702_s12 + $0x8] ss:$20 sps:$4 sm:$0xff]  }
  0xcc   : > { %1709 = vxpose.xlu1.c.b16.cont [3/8] (narrow) %v4215_v63, 64  ;;  %v4293_v63 = vld [vmem:[%s4702_s12 + $0x170] ss:$20 sps:$4 sm:$0xff]  }
  0xcf   : > { %1694 = vxpose.xlu0.c.b16.cont [4/8] (narrow) %v4218_v0, 64  ;;  %v4279_v0 = vld [vmem:[%s5509_s0 + $0x78] sm:$0xff]  }
  0xd0   : > { %1710 = vxpose.xlu1.c.b16.cont [4/8] (narrow) %v4219_v1, 64  ;;  %v4282_v1 = vld [vmem:[%s5509_s0 + $0x38] sm:$0xff]  }
  0xd3   : > { %1695 = vxpose.xlu0.c.b16.cont [5/8] (narrow) %v4222_v2, 64 }
  0xd4   : > { %1711 = vxpose.xlu1.c.b16.cont [5/8] (narrow) %v4223_v3, 64 }
  0xd7   : > { %1696 = vxpose.xlu0.c.b16.cont [6/8] (narrow) %v4226_v4, 64  ;;  %v4295_v4 = vld [vmem:[%s4702_s12 + $0x30] ss:$20 sps:$4 sm:$0xff]  }
  0xd8   : > { %1712 = vxpose.xlu1.c.b16.cont [6/8] (narrow) %v4227_v5, 64  ;;  %v4283_v5 = vld [vmem:[%s5509_s0 + $0x40] sm:$0xff]  }
  0xdb   : > { %1697 = vxpose.xlu0.c.b16.cont [7/8] (narrow) %v4230_v6, 64  ;;  %v4297_v6 = vld [vmem:[%s4702_s12 + $0x198] ss:$20 sps:$4 sm:$0xff]  }
  0xdc   : > { %v520_v9 = vpop.trf.xlu0  ;;  %1713 = vxpose.xlu1.c.b16.cont [7/8] (narrow) %v4231_v7, 64  ;;  %v4289_v7 = vld [vmem:[%s5509_s0] sm:$0xff]  }
  0xdd   : > { %v504_v11 = vpop.trf.xlu1  ;;  %4049 = vmatprep.mubr.msk.bf16.mxu1 %vm642_vm0, %v520_v9  ;;  %v4301_v9 = vld [vmem:[%s4702_s12 + $0x1c0] ss:$20 sps:$4 sm:$0xff]  }
  0xde   : > { %687 = vmatprep.mubr.bf16.mxu0 %v504_v11  ;;  %v4325_v11 = vld [vmem:[%s4702_s12 + $0x288] ss:$20 sps:$4 sm:$0xff]  }
  0xdf   : > { %1698 = vxpose.xlu0.c.b16.end [8/8] (narrow) %v4234_v8, 64  ;;  %v4299_v8 = vld [vmem:[%s4702_s12 + $0x58] ss:$20 sps:$4 sm:$0xff]  }
  0xe0   : > { %v521_v15 = vpop.trf.xlu0  ;;  %1714 = vxpose.xlu1.c.b16.end [8/8] (narrow) %v4235_v10, 64 }
  0xe1   : > { %4050 = vmatmul.mubr.msk.bf16.vlgmr.msra.gmra.mrb[0].mxu1 %vm642_vm0, %v521_v15  ;;  %v505_v31 = vpop.trf.xlu1  ;;  %v4303_v15 = vld [vmem:[%s4702_s12 + $0x80] ss:$20 sps:$4 sm:$0xff]  }
  0xe2   : > { %3856 = vmatpush3.bf16.msra.mxu1 %v4253_v12  ;;  %v4284_v12 = vld [vmem:[%s5509_s0 + $0x48] sm:$0xff]  }
  0xe3   : > { %1723 = vxpose.xlu0.c.b16.start [1/3] (short) (narrow) %v4238_v13, 64  ;;  %3857 = vmatprep.subr.bf16.mxu1 %v4256_v14  ;;  %v4294_v14 = vld [vmem:[%s5509_s0 + $0x8] sm:$0xff]  }
  0xe4   : > { %v522_v20 = vpop.trf.xlu0  ;;  %2326 = vxpose.xlu1.c.b16.start [1/3] (short) (narrow) %v4239_v16, 64  ;;  %v4286_v16 = vld [vmem:[%s5509_s0 + $0x50] sm:$0xff]  }
  0xe5   : > { %4053 = vmatprep.mubr.msk.bf16.mxu1 %vm642_vm0, %v522_v20  ;;  %v506_v42 = vpop.trf.xlu1 }
  0xe6   : > { %3858 = vmatpush3.bf16.msra.mxu1 %v4257_v17  ;;  %v4305_v17 = vld [vmem:[%s4702_s12 + $0x1e8] ss:$20 sps:$4 sm:$0xff]  }
  0xe7   : > { %1724 = vxpose.xlu0.c.b16.cont [2/3] (short) (narrow) %v4243_v18, 64  ;;  %3859 = vmatprep.subr.bf16.mxu1 %v4260_v19  ;;  %v4298_v18 = vld [vmem:[%s5509_s0 + $0x10] sm:$0xff]  }
  0xe8   : > { %v523_v26 = vpop.trf.xlu0  ;;  %2327 = vxpose.xlu1.c.b16.cont [2/3] (short) (narrow) %v4244_v21, 64  ;;  %v4307_v21 = vld [vmem:[%s4702_s12 + $0xa8] ss:$20 sps:$4 sm:$0xff]  }
  0xe9   : > { %4054 = vmatmul.mubr.msk.bf16.gmra.mrb[4].mxu1 %vm642_vm0, %v523_v26  ;;  %v507_v52 = vpop.trf.xlu1  ;;  %v4313_v26 = vld [vmem:[%s4702_s12 + $0x238] ss:$20 sps:$4 sm:$0xff]  }
  0xea   : > { %3860 = vmatpush3.bf16.msra.mxu1 %v4261_v22  ;;  %v4291_v22 = vld [vmem:[%s5509_s0 + $0x58] sm:$0xff]  }
  0xeb   : > { %1725 = vxpose.xlu0.c.b16.end [3/3] (short) (narrow) %v4248_v25, 64  ;;  %3861 = vmatprep.subr.bf16.mxu1 %v4264_v23  ;;  %v4309_v23 = vld [vmem:[%s4702_s12 + $0x210] ss:$20 sps:$4 sm:$0xff]  }
  0xec   : > { %2328 = vxpose.xlu1.c.b16.end [3/3] (short) (narrow) %v4249_v27, 64  ;;  %v488_v32 = vpop.trf.xlu0  ;;  %v4311_v25 = vld [vmem:[%s4702_s12 + $0xd0] ss:$20 sps:$4 sm:$0xff]  }
  0xed   : > { %688 = vmatmul.mubr.bf16.vlgmr.msra.gmra.mrb[0].mxu0 %v488_v32  ;;  %v4296_v27 = vld [vmem:[%s5509_s0 + $0x60] sm:$0xff]  }
  0xee   : > { %695 = vmatprep.mubr.bf16.mxu0 %v505_v31  ;;  %3862 = vmatpush3.bf16.msra.mxu1 %v4265_v28  ;;  %v4317_v32 = vld [vmem:[%s4702_s12 + $0x260] ss:$20 sps:$4 sm:$0xff]  }
  0xef   : > { %3863 = vmatprep.subr.bf16.mxu1 %v4268_v29  ;;  %4058 = vmatpush3.bf16.msra.mxu0 %v4285_v24  ;;  %v4302_v24 = vld [vmem:[%s5509_s0 + $0x18] sm:$0xff]   ;;  %v4306_v29 = vld [vmem:[%s5509_s0 + $0x20] sm:$0xff]  }
  0xf0   : > { %2310 = vxpose.xlu0.c.b16.start [1/8] (narrow) %v4251_v30, 64  ;;  %4059 = vmatprep.subr.bf16.mxu0 %v4287_v35  ;;  %v489_v41 = vpop.trf.xlu0  ;;  %v4315_v30 = vld [vmem:[%s4702_s12 + $0xf8] ss:$20 sps:$4 sm:$0xff]  }
  0xf1   : > { %2294 = vxpose.xlu1.c.b16.start [1/8] (narrow) %v4254_v33, 64  ;;  %v4300_v33 = vld [vmem:[%s5509_s0 + $0x68] sm:$0xff]  }
  0xf2   : > { %3864 = vmatpush3.bf16.msra.mxu1 %v4269_v34  ;;  %v4328_v34 = vld [vmem:[%s4702_s12 + $0x2b0] ss:$20 sps:$4 sm:$0xff]  }
  0xf3   : > { %3865 = vmatprep.subr.bf16.mxu1 %v4272_v36  ;;  %4060 = vmatpush3.bf16.msra.mxu0 %v4287_v35  ;;  %v4310_v36 = vld [vmem:[%s5509_s0 + $0x28] sm:$0xff]  }
  0xf4   : > { %2311 = vxpose.xlu0.c.b16.cont [2/8] (narrow) %v4255_v38, 64  ;;  %4061 = vmatprep.subr.bf16.mxu0 %v4292_v37  ;;  %v490_v51 = vpop.trf.xlu0  ;;  %v4304_v38 = vld [vmem:[%s5509_s0 + $0x70] sm:$0xff]  }
  0xf5   : > { %696 = vmatmul.mubr.bf16.gmra.mrb[4].mxu0 %v489_v41  ;;  %2295 = vxpose.xlu1.c.b16.cont [2/8] (narrow) %v4258_v39, 64  ;;  %v4321_v39 = vld [vmem:[%s4702_s12 + $0x14c] ss:$20 sps:$4 sm:$0xff]   ;;  %v4314_v41 = vld [vmem:[%s5509_s0 + $0x30] sm:$0xff]  }
  0xf6   : > { %703 = vmatprep.mubr.bf16.mxu0 %v506_v42  ;;  %3866 = vmatpush3.bf16.msra.mxu1 %v4273_v40  ;;  %v4331_v42 = vld [vmem:[%s4702_s12 + $0x2d8] ss:$20 sps:$4 sm:$0xff]  }
  0xf7   : > { %3867 = vmatprep.subr.bf16.mxu1 %v4276_v43  ;;  %4062 = vmatpush3.bf16.msra.mxu0 %v4292_v37  ;;  %v4319_v37 = vld [vmem:[%s4702_s12 + $0x120] ss:$20 sps:$4 sm:$0xff]  }
  0xf8   : > { %2312 = vxpose.xlu0.c.b16.cont [3/8] (narrow) %v4259_v44, 64  ;;  %v491_v59 = vpop.trf.xlu0  ;;  %4071 = vmatprep.subr.bf16.mxu0 %v4325_v11  ;;  %v5054_v43 = vld [vmem:[%s4702_s12 + $0x28c] ss:$20 sps:$4 sm:$0xff]  }
  0xf9   : > { %2296 = vxpose.xlu1.c.b16.cont [3/8] (narrow) %v4262_v45, 64  ;;  %v4308_v44 = vld [vmem:[%s5509_s0 + $0x78] sm:$0xff]  }
  0xfa   : > { %3868 = vmatpush3.bf16.msra.mxu1 %v4277_v46  ;;  %v4318_v46 = vld [vmem:[%s5509_s0 + $0x38] sm:$0xff]  }
  0xfb   : > { %3869 = vmatprep.subr.bf16.mxu1 %v4280_v47  ;;  %v4322_v47 = vld [vmem:[%s4702_s12 + $0xc] ss:$20 sps:$4 sm:$0xff]  }
  0xfc   : > { %2313 = vxpose.xlu0.c.b16.cont [4/8] (narrow) %v4263_v48, 64  ;;  %v4312_v48 = vld [vmem:[%s5509_s0 + $0x80] sm:$0xff]  }
  0xfd   : > { %704 = vmatmul.mubr.bf16.gmra.mrb[8].mxu0 %v490_v51  ;;  %2297 = vxpose.xlu1.c.b16.cont [4/8] (narrow) %v4266_v49, 64  ;;  %v1112_v56 = vpop.trf.xlu1 }
  0xfe   : > { %711 = vmatprep.mubr.bf16.mxu0 %v507_v52  ;;  %3870 = vmatpush3.bf16.msra.mxu1 %v4281_v50  ;;  %v4323_v50 = vld [vmem:[%s4702_s12 + $0x174] ss:$20 sps:$4 sm:$0xff]  }
  0xff   : > { %1294 = vmatprep.mubr.bf16.mxu1 %v1112_v56  ;;  %3902 = vmatprep.subr.bf16.mxu1 %v4288_v53  ;;  %v4316_v52 = vld [vmem:[%s5509_s0 + $0x88] sm:$0xff]   ;;  %v4320_v56 = vld [vmem:[%s5509_s0 + $0x90] sm:$0xff]  }
 0x100   : > { %2314 = vxpose.xlu0.c.b16.cont [5/8] (narrow) %v4267_v54, 64  ;;  %v4324_v53 = vld [vmem:[%s4702_s12 + $0x34] ss:$20 sps:$4 sm:$0xff]  }
 0x101   : > { %2298 = vxpose.xlu1.c.b16.cont [5/8] (narrow) %v4270_v55, 64  ;;  %v1113_v3 = vpop.trf.xlu1  ;;  %v4326_v55 = vld [vmem:[%s4702_s12 + $0x19c] ss:$20 sps:$4 sm:$0xff]  }
 0x104   : > { %2315 = vxpose.xlu0.c.b16.cont [6/8] (narrow) %v4271_v57, 64  ;;  %v4327_v57 = vld [vmem:[%s4702_s12 + $0x5c] ss:$20 sps:$4 sm:$0xff]  }
 0x105   : > { %712 = vmatmul.mubr.bf16.gmra.mrb[12].mxu0 %v491_v59  ;;  %2299 = vxpose.xlu1.c.b16.cont [6/8] (narrow) %v4274_v58, 64  ;;  %v1114_v13 = vpop.trf.xlu1  ;;  %v4329_v58 = vld [vmem:[%s4702_s12 + $0x1c4] ss:$20 sps:$4 sm:$0xff]  }
 0x108   : > { %2316 = vxpose.xlu0.c.b16.cont [7/8] (narrow) %v4275_v60, 64  ;;  %v4330_v60 = vld [vmem:[%s4702_s12 + $0x84] ss:$20 sps:$4 sm:$0xff]  }
 0x109   : > { %2300 = vxpose.xlu1.c.b16.cont [7/8] (narrow) %v4278_v61, 64  ;;  %v1096_v2 = vpop.trf.xlu0  ;;  %v1115_v19 = vpop.trf.xlu1 }
 0x10a   : > { %1295 = vmatmul.mubr.bf16.vlgmr.msra.gmra.mrb[8].mxu1 %v1096_v2 }
 0x10b   : > { %1302 = vmatprep.mubr.bf16.mxu1 %v1113_v3  ;;  %3903 = vmatpush3.bf16.msra.mxu1 %v4290_v62  ;;  %v4332_v62 = vld [vmem:[%s4702_s12 + $0x1ec] ss:$20 sps:$4 sm:$0xff]   ;;  %v4335_v3 = vld [vmem:[%s4702_s12 + $0xd4] ss:$20 sps:$4 sm:$0xff]  }
 0x10c   : > { %2317 = vxpose.xlu0.c.b16.end [8/8] (narrow) %v4279_v0, 64  ;;  %3904 = vmatprep.subr.bf16.mxu1 %v4293_v63  ;;  %v4333_v63 = vld [vmem:[%s4702_s12 + $0xac] ss:$20 sps:$4 sm:$0xff]  }
 0x10d   : > { %2301 = vxpose.xlu1.c.b16.end [8/8] (narrow) %v4282_v1, 64  ;;  %v1097_v10 = vpop.trf.xlu0  ;;  %v4334_v1 = vld [vmem:[%s4702_s12 + $0x214] ss:$20 sps:$4 sm:$0xff]  }
 0x10f   : > { %3905 = vmatpush3.bf16.msra.mxu1 %v4295_v4  ;;  %v4336_v4 = vld [vmem:[%s4702_s12 + $0x23c] ss:$20 sps:$4 sm:$0xff]  }
 0x110   : > { %2913 = vxpose.xlu0.c.b16.start [1/8] (narrow) %v4283_v5, 64  ;;  %3906 = vmatprep.subr.bf16.mxu1 %v4297_v6  ;;  %v4337_v6 = vld [vmem:[%s4702_s12 + $0xfc] ss:$20 sps:$4 sm:$0xff]  }
 0x111   : > { %2897 = vxpose.xlu1.c.b16.start [1/8] (narrow) %v4289_v7, 64  ;;  %v1098_v20 = vpop.trf.xlu0  ;;  %v4339_v7 = vld [vmem:[%s4702_s12 + $0x264] ss:$20 sps:$4 sm:$0xff]  }
 0x112   : > { %1303 = vmatmul.mubr.bf16.gmra.mrb[12].mxu1 %v1097_v10  ;;  %v4356_v10 = vld [vmem:[%s4702_s12 + $0x290] ss:$20 sps:$4 sm:$0xff]  }
 0x113   : > { %1310 = vmatprep.mubr.bf16.mxu1 %v1114_v13  ;;  %3907 = vmatpush3.bf16.msra.mxu1 %v4299_v8  ;;  %v4340_v8 = vld [vmem:[%s4702_s12 + $0x124] ss:$20 sps:$4 sm:$0xff]  }
 0x114   : > { %2914 = vxpose.xlu0.c.b16.cont [2/8] (narrow) %v4284_v12, 64  ;;  %3908 = vmatprep.subr.bf16.mxu1 %v4301_v9  ;;  %v4341_v12 = vld [vmem:[%s4702_s12 + $0x2b4] ss:$20 sps:$4 sm:$0xff]  }
 0x115   : > { %2898 = vxpose.xlu1.c.b16.cont [2/8] (narrow) %v4294_v14, 64  ;;  %v1099_v31 = vpop.trf.xlu0 }
 0x117   : > { %3909 = vmatpush3.bf16.msra.mxu1 %v4303_v15  ;;  %v4342_v15 = vld [vmem:[%s4702_s12 + $0x2dc] ss:$20 sps:$4 sm:$0xff]  }
 0x118   : > { %2915 = vxpose.xlu0.c.b16.cont [3/8] (narrow) %v4286_v16, 64  ;;  %3910 = vmatprep.subr.bf16.mxu1 %v4305_v17 }
 0x119   : > { %2899 = vxpose.xlu1.c.b16.cont [3/8] (narrow) %v4298_v18, 64  ;;  %v4343_v18 = vld [vmem:[%s4702_s12 + $0x150] ss:$20 sps:$4 sm:$0xff]  }
 0x11a   : > { %1311 = vmatmul.mubr.bf16.gmra.mrb[16].mxu1 %v1098_v20 }
 0x11b   : > { %1318 = vmatprep.mubr.bf16.mxu1 %v1115_v19  ;;  %3911 = vmatpush3.bf16.msra.mxu1 %v4307_v21 }
 0x11c   : > { %2916 = vxpose.xlu0.c.b16.cont [4/8] (narrow) %v4291_v22, 64  ;;  %3912 = vmatprep.subr.bf16.mxu1 %v4309_v23  ;;  %v4360_v22 = vld [vmem:[%s4702_s12 + $0x2b8] ss:$20 sps:$4 sm:$0xff]  }
 0x11d   : > { %v1128_v28 = vpop.trf.xlu1  ;;  %2900 = vxpose.xlu1.c.b16.cont [4/8] (narrow) %v4302_v24, 64  ;;  %v4344_v24 = vld [vmem:[%s4702_s12 + $0x10] ss:$20 sps:$4 sm:$0xff]  }
 0x11e   : > { %4063 = vmatprep.mubr.msk.bf16.mxu0 %vm642_vm0, %v1128_v28  ;;  %v4346_v28 = vld [vmem:[%s4702_s12 + $0x38] ss:$20 sps:$4 sm:$0xff]  }
 0x11f   : > { %3913 = vmatpush3.bf16.msra.mxu1 %v4311_v25  ;;  %v4345_v25 = vld [vmem:[%s4702_s12 + $0x178] ss:$20 sps:$4 sm:$0xff]  }
 0x120   : > { %2917 = vxpose.xlu0.c.b16.cont [5/8] (narrow) %v4296_v27, 64  ;;  %3914 = vmatprep.subr.bf16.mxu1 %v4313_v26  ;;  %v4361_v27 = vld [vmem:[%s4702_s12 + $0x2e0] ss:$20 sps:$4 sm:$0xff]  }
 0x121   : > { %v1129_v35 = vpop.trf.xlu1  ;;  %2901 = vxpose.xlu1.c.b16.cont [5/8] (narrow) %v4306_v29, 64 }
 0x122   : > { %4064 = vmatmul.mubr.msk.bf16.vlgmr.msra.gmra.mrb[16].mxu0 %vm642_vm0, %v1129_v35  ;;  %1319 = vmatmul.mubr.bf16.gmra.mrb[20].mxu1 %v1099_v31 }
 0x123   : > { %3915 = vmatpush3.bf16.msra.mxu1 %v4315_v30  ;;  %4072 = vmatpush3.bf16.msra.mxu0 %v4325_v11  ;;  %v4347_v30 = vld [vmem:[%s4702_s12 + $0x1a0] ss:$20 sps:$4 sm:$0xff]  }
 0x124   : > { %2918 = vxpose.xlu0.c.b16.cont [6/8] (narrow) %v4300_v33, 64  ;;  %3916 = vmatprep.subr.bf16.mxu1 %v4317_v32  ;;  %v4348_v32 = vld [vmem:[%s4702_s12 + $0x60] ss:$20 sps:$4 sm:$0xff]   ;;  %v4349_v33 = vld [vmem:[%s4702_s12 + $0x1c8] ss:$20 sps:$4 sm:$0xff]  }
 0x125   : > { %v1130_v40 = vpop.trf.xlu1  ;;  %2902 = vxpose.xlu1.c.b16.cont [6/8] (narrow) %v4310_v36, 64  ;;  %4073 = vmatprep.subr.bf16.mxu0 %v4328_v34  ;;  %v4351_v36 = vld [vmem:[%s4702_s12 + $0x1f0] ss:$20 sps:$4 sm:$0xff]  }
 0x126   : > { %4067 = vmatprep.mubr.msk.bf16.mxu0 %vm642_vm0, %v1130_v40  ;;  %v4354_v40 = vld [vmem:[%s4702_s12 + $0xd8] ss:$20 sps:$4 sm:$0xff]  }
 0x127   : > { %3917 = vmatpush3.bf16.msra.mxu1 %v4319_v37  ;;  %4074 = vmatpush3.bf16.msra.mxu0 %v4328_v34  ;;  %v4350_v34 = vld [vmem:[%s4702_s12 + $0x88] ss:$20 sps:$4 sm:$0xff]  }
 0x128   : > { %2919 = vxpose.xlu0.c.b16.cont [7/8] (narrow) %v4304_v38, 64  ;;  %3949 = vmatprep.subr.bf16.mxu1 %v4321_v39  ;;  %v4352_v38 = vld [vmem:[%s4702_s12 + $0xb0] ss:$20 sps:$4 sm:$0xff]   ;;  %v4353_v39 = vld [vmem:[%s4702_s12 + $0x218] ss:$20 sps:$4 sm:$0xff]  }
 0x129   : > { %v1131_v45 = vpop.trf.xlu1  ;;  %2903 = vxpose.xlu1.c.b16.cont [7/8] (narrow) %v4314_v41, 64  ;;  %4075 = vmatprep.subr.bf16.mxu0 %v4331_v42  ;;  %v1699_v49 = vpop.trf.xlu0 }
 0x12a   : > { %4068 = vmatmul.mubr.msk.bf16.gmra.mrb[20].mxu0 %vm642_vm0, %v1131_v45 }
 0x12b   : > { %4076 = vmatpush3.bf16.msra.mxu0 %v4331_v42  ;;  %v4355_v42 = vld [vmem:[%s4702_s12 + $0x240] ss:$20 sps:$4 sm:$0xff]  }
 0x12c   : > { %2920 = vxpose.xlu0.c.b16.end [8/8] (narrow) %v4308_v44, 64  ;;  %4085 = vmatprep.subr.bf16.mxu0 %v5054_v43  ;;  %v4358_v44 = vld [vmem:[%s4702_s12 + $0x268] ss:$20 sps:$4 sm:$0xff]  }
 0x12d   : > { %2904 = vxpose.xlu1.c.b16.end [8/8] (narrow) %v4318_v46, 64  ;;  %v1715_v51 = vpop.trf.xlu1  ;;  %v1700_v59 = vpop.trf.xlu0  ;;  %v4359_v46 = vld [vmem:[%s4702_s12 + $0x128] ss:$20 sps:$4 sm:$0xff]  }
 0x12e   : > { %1897 = vmatprep.mubr.bf16.mxu1 %v1715_v51 }
 0x12f   : > { %1898 = vmatmul.mubr.bf16.vlgmr.msra.gmra.mrb[24].mxu1 %v1699_v49 }
 0x130   : > { %2929 = vxpose.xlu0.c.b16.start [1/3] (short) (narrow) %v4312_v48, 64  ;;  %3950 = vmatpush3.bf16.msra.mxu1 %v4322_v47 }
 0x131   : > { %v1716_v54 = vpop.trf.xlu1  ;;  %3951 = vmatprep.subr.bf16.mxu1 %v4323_v50  ;;  %v1701_v0 = vpop.trf.xlu0 }
 0x132   : > { %1905 = vmatprep.mubr.bf16.mxu1 %v1716_v54 }
 0x134   : > { %2930 = vxpose.xlu0.c.b16.cont [2/3] (short) (narrow) %v4316_v52, 64  ;;  %3952 = vmatpush3.bf16.msra.mxu1 %v4324_v53 }
 0x135   : > { %3953 = vmatprep.subr.bf16.mxu1 %v4326_v55  ;;  %v1717_v61 = vpop.trf.xlu1  ;;  %v1702_v5 = vpop.trf.xlu0 }
 0x137   : > { %1906 = vmatmul.mubr.bf16.gmra.mrb[28].mxu1 %v1700_v59 }
 0x138   : > { %2931 = vxpose.xlu0.c.b16.end [3/3] (short) (narrow) %v4320_v56, 64  ;;  %3954 = vmatpush3.bf16.msra.mxu1 %v4327_v57 }
 0x139   : > { %3955 = vmatprep.subr.bf16.mxu1 %v4329_v58  ;;  %1913 = vmatprep.mubr.bf16.mxu1 %v1717_v61  ;;  %v1718_v2 = vpop.trf.xlu1 }
 0x13c   : > { %3956 = vmatpush3.bf16.msra.mxu1 %v4330_v60 }
 0x13d   : > { %3957 = vmatprep.subr.bf16.mxu1 %v4332_v62 }
 0x13f   : > { %1914 = vmatmul.mubr.bf16.gmra.mrb[32].mxu1 %v1701_v0 }
 0x140   : > { %3958 = vmatpush3.bf16.msra.mxu1 %v4333_v63  ;;  %1921 = vmatprep.mubr.bf16.mxu1 %v1718_v2 }
 0x141   : > { %3959 = vmatprep.subr.bf16.mxu1 %v4334_v1 }
 0x144   : > { %3960 = vmatpush3.bf16.msra.mxu1 %v4335_v3 }
 0x145   : > { %3961 = vmatprep.subr.bf16.mxu1 %v4336_v4 }
 0x147   : > { %1922 = vmatmul.mubr.bf16.gmra.mrb[36].mxu1 %v1702_v5 }
 0x148   : > { %3962 = vmatpush3.bf16.msra.mxu1 %v4337_v6 }
 0x149   : > { %v1731_v9 = vpop.trf.xlu0  ;;  %3963 = vmatprep.subr.bf16.mxu1 %v4339_v7 }
 0x14a   : > { %v2334_v11 = vpop.trf.xlu1  ;;  %4077 = vmatprep.mubr.msk.bf16.mxu0 %vm642_vm0, %v1731_v9 }
 0x14c   : > { %3964 = vmatpush3.bf16.msra.mxu1 %v4340_v8 }
 0x14d   : > { %v1732_v13 = vpop.trf.xlu0  ;;  %4099 = vmatprep.subr.bf16.mxu1 %v4356_v10 }
 0x14e   : > { %v2335_v14 = vpop.trf.xlu1  ;;  %4078 = vmatmul.mubr.msk.bf16.vlgmr.msra.gmra.mrb[24].mxu0 %vm642_vm0, %v1732_v13 }
 0x14f   : > { %4086 = vmatpush3.bf16.msra.mxu0 %v5054_v43  ;;  %v4357_v43 = vld [vmem:[%s4702_s12 + $0x100] ss:$20 sps:$4 sm:$0xff]   ;;  %s4118_s12 = smul.u32 140, %s4698_s1 }
 0x150   : > { %4087 = vmatprep.subr.bf16.mxu0 %v4341_v12  ;;  %s3807_s1 = smul.u32 (%p5530_p1), 20, %s4552_s19 }
 0x151   : > { %v1733_v16 = vpop.trf.xlu0  ;;  %s5223_s13 = scalar_lea.vmem [#allocation7], %s4118_s12 }
 0x152   : > { %v2336_v17 = vpop.trf.xlu1  ;;  %4081 = vmatprep.mubr.msk.bf16.mxu0 %vm642_vm0, %v1733_v16  ;;  %s5458_s18 = scalar_lea.vmem (%p5530_p1), %s5513_s4, %s3807_s1 }
 0x153   : > { %4088 = vmatpush3.bf16.msra.mxu0 %v4341_v12 }
 0x154   : > { %4089 = vmatprep.subr.bf16.mxu0 %v4342_v15 }
 0x155   : > { %v1734_v19 = vpop.trf.xlu0 }
 0x156   : > { %v2337_v20 = vpop.trf.xlu1  ;;  %4082 = vmatmul.mubr.msk.bf16.gmra.mrb[28].mxu0 %vm642_vm0, %v1734_v19 }
 0x157   : > { %4090 = vmatpush3.bf16.msra.mxu0 %v4342_v15  ;;  %4091 = vmatprep.mubr.msk.bf16.mxu0 %vm642_vm0, %v2334_v11 }
 0x158   : > { %3996 = vmatprep.subr.bf16.mxu0 %v4343_v18 }
 0x159   : > { %v2318_v21 = vpop.trf.xlu0 }
 0x15a   : > { %v2302_v23 = vpop.trf.xlu1  ;;  %2500 = vmatprep.mubr.bf16.mxu1 %v2318_v21 }
 0x15b   : > { %2501 = vmatmul.mubr.bf16.vlgmr.msra.gmra.mrb[40].mxu1 %v2302_v23 }
 0x15c   : > { %4100 = vmatpush3.bf16.msra.mxu1 %v4356_v10 }
 0x15d   : > { %v2319_v26 = vpop.trf.xlu0  ;;  %4101 = vmatprep.subr.bf16.mxu1 %v4360_v22 }
 0x15e   : > { %2508 = vmatprep.mubr.bf16.mxu1 %v2319_v26  ;;  %4092 = vmatmul.mubr.msk.bf16.vlgmr.msra.gmra.mrb[32].mxu0 %vm642_vm0, %v2335_v14  ;;  %v2303_v29 = vpop.trf.xlu1 }
 0x15f   : > { %3997 = vmatpush3.bf16.msra.mxu0 %v4344_v24  ;;  %4095 = vmatprep.mubr.msk.bf16.mxu0 %vm642_vm0, %v2336_v17 }
 0x160   : > { %3998 = vmatprep.subr.bf16.mxu0 %v4345_v25  ;;  %4102 = vmatpush3.bf16.msra.mxu1 %v4360_v22 }
 0x161   : > { %v2320_v31 = vpop.trf.xlu0  ;;  %4103 = vmatprep.subr.bf16.mxu1 %v4361_v27 }
 0x162   : > { %v2304_v35 = vpop.trf.xlu1 }
 0x163   : > { %2509 = vmatmul.mubr.bf16.gmra.mrb[44].mxu1 %v2303_v29  ;;  %3999 = vmatpush3.bf16.msra.mxu0 %v4346_v28 }
 0x164   : > { %2516 = vmatprep.mubr.bf16.mxu1 %v2320_v31  ;;  %4000 = vmatprep.subr.bf16.mxu0 %v4347_v30 }
 0x165   : > { %4104 = vmatpush3.bf16.msra.mxu1 %v4361_v27  ;;  %v2321_v37 = vpop.trf.xlu0 }
 0x166   : > { %4096 = vmatmul.mubr.msk.bf16.gmra.mrb[36].mxu0 %vm642_vm0, %v2337_v20  ;;  %v2305_v41 = vpop.trf.xlu1 }
 0x167   : > { %4001 = vmatpush3.bf16.msra.mxu0 %v4348_v32 }
 0x168   : > { %4002 = vmatprep.subr.bf16.mxu0 %v4349_v33 }
 0x16b   : > { %2517 = vmatmul.mubr.bf16.gmra.mrb[48].mxu1 %v2304_v35  ;;  %4003 = vmatpush3.bf16.msra.mxu0 %v4350_v34 }
 0x16c   : > { %2524 = vmatprep.mubr.bf16.mxu1 %v2321_v37  ;;  %4004 = vmatprep.subr.bf16.mxu0 %v4351_v36 }
 0x16f   : > { %4005 = vmatpush3.bf16.msra.mxu0 %v4352_v38 }
 0x170   : > { %4006 = vmatprep.subr.bf16.mxu0 %v4353_v39 }
 0x173   : > { %2525 = vmatmul.mubr.bf16.gmra.mrb[52].mxu1 %v2305_v41  ;;  %4007 = vmatpush3.bf16.msra.mxu0 %v4354_v40 }
 0x174   : > { %4008 = vmatprep.subr.bf16.mxu0 %v4355_v42 }
 0x176   : > { %v2921_v45 = vpop.trf.xlu0 }
 0x177   : > { %4009 = vmatpush3.bf16.msra.mxu0 %v4357_v43  ;;  %3103 = vmatprep.mubr.bf16.mxu0 %v2921_v45  ;;  %v2905_v47 = vpop.trf.xlu1 }
 0x178   : > { %4010 = vmatprep.subr.bf16.mxu0 %v4358_v44 }
 0x17a   : > { %v2922_v48 = vpop.trf.xlu0 }
 0x17b   : > { %4011 = vmatpush3.bf16.msra.mxu0 %v4359_v46  ;;  %v2906_v49 = vpop.trf.xlu1 }
 0x17e   : > { %3104 = vmatmul.mubr.bf16.vlgmr.msra.gmra.mrb[40].mxu0 %v2905_v47  ;;  %v2923_v50 = vpop.trf.xlu0 }
 0x17f   : > { %3111 = vmatprep.mubr.bf16.mxu0 %v2922_v48  ;;  %v2907_v51 = vpop.trf.xlu1 }
 0x182   : > { %v2924_v52 = vpop.trf.xlu0 }
 0x183   : > { %v2908_v53 = vpop.trf.xlu1 }
 0x186   : > { %3112 = vmatmul.mubr.bf16.gmra.mrb[44].mxu0 %v2906_v49 }
 0x187   : > { %3119 = vmatprep.mubr.bf16.mxu0 %v2923_v50 }
 0x18e   : > { %3120 = vmatmul.mubr.bf16.gmra.mrb[48].mxu0 %v2907_v51 }
 0x18f   : > { %3127 = vmatprep.mubr.bf16.mxu0 %v2924_v52 }
 0x196   : > { %v2937_v54 = vpop.trf.xlu0  ;;  %3128 = vmatmul.mubr.bf16.gmra.mrb[52].mxu0 %v2908_v53 }
 0x197   : > { %4105 = vmatprep.mubr.msk.bf16.mxu1 %vm642_vm0, %v2937_v54 }
 0x19a   : > { %v2938_v55 = vpop.trf.xlu0 }
 0x19b   : > { %4106 = vmatmul.mubr.msk.bf16.vlgmr.msra.gmra.mrb[56].mxu1 %vm642_vm0, %v2938_v55 }
 0x19e   : > { %v2939_v56 = vpop.trf.xlu0 }
 0x19f   : > { %4109 = vmatprep.mubr.msk.bf16.mxu1 %vm642_vm0, %v2939_v56 }
 0x1a2   : > { %v2940_v57 = vpop.trf.xlu0 }
 0x1a3   : > { %4110 = vmatmul.mubr.msk.bf16.gmra.mrb[60].mxu1 %vm642_vm0, %v2940_v57 }
 0x1b4   : > { %v4051_v58 = vpop.f32.mrb[0].mxu1 }
 0x1b5   : > { %v753_v59 = vpop.f32.mrb[1].mxu1 }
 0x1b6   : > { %v4052_v60 = vpop.f32.mrb[2].mxu1 }
 0x1b7   : > { %v756_v61 = vpop.f32.mrb[3].mxu1 }
 0x1bc   : > { %v4055_v62 = vpop.f32.mrb[4].mxu1 }
 0x1bd   : > { %v769_v63 = vpop.f32.mrb[5].mxu1 }
 0x1be   : > { %v4056_v0 = vpop.f32.mrb[6].mxu1 }
 0x1bf   : > { %v772_v1 = vpop.f32.mrb[7].mxu1 }
 0x1c0   : > { %v3824_v2 = vpop.f32.mrb[0].mxu0 }
 0x1c1   : > { %v3825_v3 = vpop.f32.mrb[1].mxu0 }
 0x1c2   : > { %v3826_v4 = vadd.f32 %v3825_v3, %v3824_v2  ;;  %v3827_v5 = vpop.f32.mrb[2].mxu0 }
 0x1c3   : > { %v3828_v6 = vpop.f32.mrb[3].mxu0 }
 0x1c4   : > { %v3829_v7 = vadd.f32 %v3828_v6, %v3827_v5  ;;  %v754_v8 = vadd.f32 %v3826_v4, %v753_v59 }
 0x1c6   : > { %v757_v9 = vadd.f32 %v3829_v7, %v756_v61 }
 0x1c8   : > { %v3830_v10 = vpop.f32.mrb[4].mxu0  ;;  %v783_v11 = vadd.f32 %v757_v9, %v754_v8 }
 0x1c9   : > { %v3831_v12 = vpop.f32.mrb[5].mxu0 }
 0x1ca   : > { %v3832_v13 = vadd.f32 %v3831_v12, %v3830_v10  ;;  %v3833_v14 = vpop.f32.mrb[6].mxu0 }
 0x1cb   : > { %v3834_v15 = vpop.f32.mrb[7].mxu0 }
 0x1cc   : > { %v762_v16 = vadd.f32 %v4051_v58, %v3832_v13  ;;  %v3835_v17 = vadd.f32 %v3834_v15, %v3833_v14 }
 0x1ce   : > { %v784_v18 = vadd.f32 %v783_v11, %v762_v16  ;;  %v765_v19 = vadd.f32 %v4052_v60, %v3835_v17 }
 0x1d0   : > { %v3836_v20 = vpop.f32.mrb[8].mxu0  ;;  %v785_v21 = vadd.f32 %v784_v18, %v765_v19 }
 0x1d1   : > { %v3837_v22 = vpop.f32.mrb[9].mxu0 }
 0x1d2   : > { %v3838_v23 = vadd.f32 %v3837_v22, %v3836_v20  ;;  %v3839_v24 = vpop.f32.mrb[10].mxu0 }
 0x1d3   : > { %v3840_v25 = vpop.f32.mrb[11].mxu0 }
 0x1d4   : > { %v3841_v26 = vadd.f32 %v3840_v25, %v3839_v24  ;;  %v770_v27 = vadd.f32 %v3838_v23, %v769_v63 }
 0x1d6   : > { %v786_v28 = vadd.f32 %v785_v21, %v770_v27  ;;  %v773_v29 = vadd.f32 %v3841_v26, %v772_v1 }
 0x1d8   : > { %v3842_v30 = vpop.f32.mrb[12].mxu0  ;;  %v787_v31 = vadd.f32 %v786_v28, %v773_v29 }
 0x1d9   : > { %v3843_v32 = vpop.f32.mrb[13].mxu0 }
 0x1da   : > { %v3844_v33 = vadd.f32 %v3843_v32, %v3842_v30  ;;  %v3845_v34 = vpop.f32.mrb[14].mxu0 }
 0x1db   : > { %v3846_v35 = vpop.f32.mrb[15].mxu0 }
 0x1dc   : > { %v778_v36 = vadd.f32 %v4055_v62, %v3844_v33 }
 0x1dd   : > { %v3871_v37 = vpop.f32.mrb[8].mxu1 }
 0x1de   : > { %v789_v38 = vsel %vm788_vm1, %v778_v36, 0.0  ;;  %v3872_v39 = vpop.f32.mrb[9].mxu1 }
 0x1df   : > { %v790_v40 = vadd.f32 %v789_v38, %v787_v31  ;;  %v3873_v41 = vadd.f32 %v3872_v39, %v3871_v37  ;;  %v3874_v42 = vpop.f32.mrb[10].mxu1 }
 0x1e0   : > { %v3875_v43 = vpop.f32.mrb[11].mxu1 }
 0x1e1   : > { %v791_v44 = vrot.slane %v790_v40, 4  ;;  %v3876_v45 = vadd.f32 %v3875_v43, %v3874_v42 }
 0x1e3   : > { %v792_v46 = vadd.f32 %v791_v44, %v790_v40 }
 0x1e5   : > { %v793_v47 = vrot.slane %v792_v46, 2  ;;  %v3877_v48 = vpop.f32.mrb[12].mxu1 }
 0x1e6   : > { %v3878_v49 = vpop.f32.mrb[13].mxu1 }
 0x1e7   : > { %v794_v50 = vadd.f32 %v793_v47, %v792_v46  ;;  %v3879_v51 = vadd.f32 %v3878_v49, %v3877_v48  ;;  %v3880_v52 = vpop.f32.mrb[14].mxu1 }
 0x1e8   : > { %v3881_v53 = vpop.f32.mrb[15].mxu1 }
 0x1e9   : > { %v795_v54 = vrot.slane %v794_v50, 1  ;;  %v3882_v55 = vadd.f32 %v3881_v53, %v3880_v52 }
 0x1eb   : > { %v796_v56 = vadd.f32 %v795_v54, %v794_v50 }
 0x1ed   : > { %v797_v57 = vmul.f32 0.020408163, %v796_v56  ;;  %v3883_v58 = vpop.f32.mrb[16].mxu1 }
 0x1ee   : > { %v3884_v59 = vpop.f32.mrb[17].mxu1 }
 0x1ef   : > { %v5123_v60 = vsub.f32 %v754_v8, %v797_v57  ;;  %v5125_v61 = vsub.f32 %v757_v9, %v797_v57  ;;  %v5127_v62 = vsub.f32 %v762_v16, %v797_v57  ;;  %v5129_v63 = vsub.f32 %v765_v19, %v797_v57  ;;  %v3886_v0 = vpop.f32.mrb[18].mxu1 }
 0x1f0   : > { %v5131_v1 = vsub.f32 %v770_v27, %v797_v57  ;;  %v5133_v2 = vsub.f32 %v773_v29, %v797_v57  ;;  %v5135_v3 = vsub.f32 %v778_v36, %v797_v57  ;;  %v3885_v4 = vadd.f32 %v3884_v59, %v3883_v58  ;;  %v3887_v5 = vpop.f32.mrb[19].mxu1 }
 0x1f1   : > { %v805_v6 = vmul.f32 %v5123_v60, %v5123_v60  ;;  %v806_v7 = vmul.f32 %v5125_v61, %v5125_v61  ;;  %v807_v8 = vmul.f32 %v5127_v62, %v5127_v62  ;;  %v3888_v9 = vadd.f32 %v3887_v5, %v3886_v0 }
 0x1f2   : > { %v808_v10 = vmul.f32 %v5129_v63, %v5129_v63  ;;  %v809_v12 = vmul.f32 %v5131_v1, %v5131_v1  ;;  %v811_v16 = vmul.f32 %v5135_v3, %v5135_v3  ;;  %v810_v20 = vmul.f32 %v5133_v2, %v5133_v2 }
 0x1f3   : > { %v812_v11 = vadd.f32 %v806_v7, %v805_v6 }
 0x1f4   : > { %v817_v31 = vsel %vm788_vm1, %v811_v16, 0.0  ;;  %v831_v16 = vlaneseq }
 0x1f5   : > { %v813_v13 = vadd.f32 %v812_v11, %v807_v8  ;;  %v4065_v14 = vpop.f32.mrb[16].mxu0  ;;  %v3889_v15 = vpop.f32.mrb[20].mxu1 }
 0x1f6   : > { %v1360_v17 = vpop.f32.mrb[17].mxu0  ;;  %v5149_v18 = vadd.f32 %v4065_v14, %v3879_v51  ;;  %v3890_v19 = vpop.f32.mrb[21].mxu1 }
 0x1f7   : > { %v814_v21 = vadd.f32 %v813_v13, %v808_v10  ;;  %v1361_v22 = vadd.f32 %v3873_v41, %v1360_v17  ;;  %v4066_v23 = vpop.f32.mrb[18].mxu0  ;;  %v3891_v24 = vadd.f32 %v3890_v19, %v3889_v15  ;;  %v3892_v25 = vpop.f32.mrb[22].mxu1 }
 0x1f8   : > { %v1363_v26 = vpop.f32.mrb[19].mxu0  ;;  %v1372_v27 = vadd.f32 %v4066_v23, %v3882_v55  ;;  %v3893_v28 = vpop.f32.mrb[23].mxu1  ;;  %v832_v23 = vshrl.u32 %v831_v16, 7 }
 0x1f9   : > { %v815_v29 = vadd.f32 %v814_v21, %v809_v12  ;;  %v1364_v30 = vadd.f32 %v3876_v45, %v1363_v26 }
 0x1fb   : > { %v816_v32 = vadd.f32 %v815_v29, %v810_v20  ;;  %v1390_v33 = vadd.f32 %v1364_v30, %v1361_v22 }
 0x1fd   : > { %v818_v34 = vadd.f32 %v817_v31, %v816_v32  ;;  %v1391_v35 = vadd.f32 %v1390_v33, %v5149_v18  ;;  %v4069_v36 = vpop.f32.mrb[20].mxu0 }
 0x1fe   : > { %v1376_v37 = vpop.f32.mrb[21].mxu0  ;;  %v1385_v38 = vadd.f32 %v4069_v36, %v3891_v24 }
 0x1ff   : > { %v819_v39 = vrot.slane %v818_v34, 4  ;;  %v1377_v40 = vadd.f32 %v3885_v4, %v1376_v37  ;;  %v1392_v41 = vadd.f32 %v1391_v35, %v1372_v27  ;;  %v4070_v42 = vpop.f32.mrb[22].mxu0  ;;  %v826_v37 = vld [vmem:[%s4712_s15] sm:$0x1] }
 0x200   : > { %v1379_v43 = vpop.f32.mrb[23].mxu0  ;;  %v1395_v45 = vsel %vm788_vm1, %v1385_v38, 0.0 }
 0x201   : > { %v820_v44 = vadd.f32 %v819_v39, %v818_v34  ;;  %v1393_v46 = vadd.f32 %v1392_v41, %v1377_v40  ;;  %v1380_v47 = vadd.f32 %v3888_v9, %v1379_v43 }
 0x202   : > { %v3918_v48 = vpop.f32.mrb[24].mxu1 }
 0x203   : > { %v821_v49 = vrot.slane %v820_v44, 2  ;;  %v1394_v50 = vadd.f32 %v1393_v46, %v1380_v47  ;;  %v3919_v51 = vpop.f32.mrb[25].mxu1 }
 0x204   : > { %v5156_v52 = vadd.f32 %v3919_v51, %v3918_v48  ;;  %v3921_v53 = vpop.f32.mrb[26].mxu1 }
 0x205   : > { %v822_v54 = vadd.f32 %v821_v49, %v820_v44  ;;  %v1396_v55 = vadd.f32 %v1395_v45, %v1394_v50  ;;  %v3922_v56 = vpop.f32.mrb[27].mxu1  ;;  %v3544_v50 = vld [vmem:[%s5202_s5] ss:$0 sm:$0xff] }
 0x206   : > { %v5158_v57 = vadd.f32 %v3922_v56, %v3921_v53 }
 0x207   : > { %v823_v58 = vrot.slane %v822_v54, 1  ;;  %v1397_v59 = vrot.slane %v1396_v55, 4 }
 0x209   : > { %v824_v0 = vadd.f32 %v823_v58, %v822_v54  ;;  %v1398_v4 = vadd.f32 %v1397_v59, %v1396_v55 }
 0x20a   : > { %v3924_v5 = vpop.f32.mrb[28].mxu1 }
 0x20b   : > { %v825_v6 = vmul.f32 0.020408163, %v824_v0  ;;  %v1399_v7 = vrot.slane %v1398_v4, 2  ;;  %v3925_v8 = vpop.f32.mrb[29].mxu1 }
 0x20c   : > { %v5160_v9 = vadd.f32 %v3925_v8, %v3924_v5  ;;  %v3927_v10 = vpop.f32.mrb[30].mxu1 }
 0x20d   : > { %v827_v11 = vadd.f32 0.001, %v825_v6  ;;  %v1400_v12 = vadd.f32 %v1399_v7, %v1398_v4  ;;  %v3928_v13 = vpop.f32.mrb[31].mxu1 }
 0x20e   : > { %v5162_v14 = vadd.f32 %v3928_v13, %v3927_v10 }
 0x20f   : > { %4362 = vrsqrt.f32 %v827_v11  ;;  %v1401_v15 = vrot.slane %v1400_v12, 1 }
 0x211   : > { %v1402_v17 = vadd.f32 %v1401_v15, %v1400_v12 }
 0x212   : > { %v3930_v19 = vpop.f32.mrb[32].mxu1 }
 0x213   : > { %v1403_v20 = vmul.f32 0.020408163, %v1402_v17  ;;  %v3931_v21 = vpop.f32.mrb[33].mxu1 }
 0x214   : > { %v5164_v24 = vadd.f32 %v3931_v21, %v3930_v19  ;;  %v3933_v25 = vpop.f32.mrb[34].mxu1 }
 0x215   : > { %v5166_v26 = vsub.f32 %v1361_v22, %v1403_v20  ;;  %v5168_v28 = vsub.f32 %v1364_v30, %v1403_v20  ;;  %v5171_v29 = vsub.f32 %v5149_v18, %v1403_v20  ;;  %v5173_v31 = vsub.f32 %v1372_v27, %v1403_v20  ;;  %v3934_v32 = vpop.f32.mrb[35].mxu1 }
 0x216   : > { %v5175_v33 = vsub.f32 %v1377_v40, %v1403_v20  ;;  %v5177_v34 = vsub.f32 %v1380_v47, %v1403_v20  ;;  %v5179_v35 = vsub.f32 %v1385_v38, %v1403_v20  ;;  %v5181_v36 = vadd.f32 %v3934_v32, %v3933_v25 }
 0x217   : > { %v1411_v22 = vmul.f32 %v5166_v26, %v5166_v26  ;;  %v1412_v18 = vmul.f32 %v5168_v28, %v5168_v28  ;;  %v1413_v27 = vmul.f32 %v5171_v29, %v5171_v29  ;;  %v5190_v30 = vsub.s32 0, %v832_v23 }
 0x218   : > { %v1417_v38 = vmul.f32 %v5179_v35, %v5179_v35  ;;  %v1414_v43 = vmul.f32 %v5173_v31, %v5173_v31  ;;  %v1415_v44 = vmul.f32 %v5175_v33, %v5175_v33  ;;  %v1416_v51 = vmul.f32 %v5177_v34, %v5177_v34 }
 0x219   : > { %v4363_v39 = vpop.eup %4362  ;;  %v1418_v40 = vadd.f32 %v1412_v18, %v1411_v22 }
 0x21a   : > { %v829_v41 = vmul.f32 %v4363_v39, %v826_v37  ;;  %v3936_v42 = vpop.f32.mrb[36].mxu1  ;;  %v1423_v54 = vsel %vm788_vm1, %v1417_v38, 0.0 }
 0x21b   : > { %v1419_v46 = vadd.f32 %v1418_v40, %v1413_v27  ;;  %v3937_v47 = vpop.f32.mrb[37].mxu1 }
 0x21c   : > { %v834_v45 = vrot.slane %v829_v41, %v5190_v30  ;;  %v3938_v48 = vadd.f32 %v3937_v47, %v3936_v42  ;;  %v3939_v49 = vpop.f32.mrb[38].mxu1 }
 0x21d   : > { %v1420_v53 = vadd.f32 %v1419_v46, %v1414_v43  ;;  %v3940_v55 = vpop.f32.mrb[39].mxu1 }
 0x21e   : > { %v836_v56 = vmul.f32 %v834_v45, %v5123_v60  ;;  %v837_v58 = vmul.f32 %v834_v45, %v5125_v61  ;;  %v838_v59 = vmul.f32 %v834_v45, %v5127_v62  ;;  %v839_v0 = vmul.f32 %v834_v45, %v5129_v63 }
 0x21f   : > { %v840_v4 = vmul.f32 %v834_v45, %v5131_v1  ;;  %v841_v5 = vmul.f32 %v834_v45, %v5133_v2  ;;  %v842_v6 = vmul.f32 %v834_v45, %v5135_v3  ;;  %v1421_v7 = vadd.f32 %v1420_v53, %v1415_v44  ;;  %v895_v3 = vld [vmem:[%s5223_s13 + $0x78] sm:$0x1] }
 0x220   : > { %v850_v8 = vadd.f32 %v3544_v50, %v836_v56  ;;  %v851_v10 = vadd.f32 %v3544_v50, %v837_v58  ;;  %v852_v11 = vadd.f32 %v3544_v50, %v838_v59  ;;  %v853_v12 = vadd.f32 %v3544_v50, %v839_v0 }
 0x221   : > { %v854_v13 = vadd.f32 %v3544_v50, %v840_v4  ;;  %v855_v60 = vadd.f32 %v3544_v50, %v841_v5  ;;  %v856_v15 = vadd.f32 %v3544_v50, %v842_v6  ;;  %v1422_v61 = vadd.f32 %v1421_v7, %v1416_v51  ;;  %v4079_v16 = vpop.f32.mrb[24].mxu0 }
 0x222   : > { %v3772_v62 = vpack.c.bf16 %v850_v8, %v850_v8  ;;  %v3773_v17 = vpack.c.bf16 %v851_v10, %v851_v10  ;;  %v3774_v63 = vpack.c.bf16 %v852_v11, %v852_v11  ;;  %v3775_v19 = vpack.c.bf16 %v853_v12, %v853_v12  ;;  %v1963_v1 = vpop.f32.mrb[25].mxu0 }
 0x223   : > { %v3776_v20 = vpack.c.bf16 %v854_v13, %v854_v13  ;;  %v3777_v21 = vpack.c.bf16 %v855_v60, %v855_v60  ;;  %v3778_v23 = vpack.c.bf16 %v856_v15, %v856_v15  ;;  %v1424_v25 = vadd.f32 %v1423_v54, %v1422_v61  ;;  %v4080_v32 = vpop.f32.mrb[26].mxu0 }
 0x224   : > { %886 = vst [vmem:[%s5223_s13] sm:$0xf] %v3772_v62  ;;  %887 = vst [vmem:[%s5223_s13 + $0x14] sm:$0xf] %v3773_v17  ;;  %v5231_v37 = vadd.f32 %v4079_v16, %v5160_v9  ;;  %v5234_v22 = vadd.f32 %v5156_v52, %v1963_v1  ;;  %v5237_v18 = vadd.f32 %v4080_v32, %v5162_v14  ;;  %v1966_v27 = vpop.f32.mrb[27].mxu0 }
 0x225   : > { %888 = vst [vmem:[%s5223_s13 + $0x28] sm:$0xf] %v3774_v63  ;;  %889 = vst [vmem:[%s5223_s13 + $0x3c] sm:$0xf] %v3775_v19  ;;  %v1425_v39 = vrot.slane %v1424_v25, 4  ;;  %v5242_v38 = vadd.f32 %v5158_v57, %v1966_v27  ;;  %v896_v40 = vsel %vm5217_vm3, %v3778_v23, %v895_v3 }
 0x226   : > { %890 = vst [vmem:[%s5223_s13 + $0x50] sm:$0xf] %v3776_v20  ;;  %891 = vst [vmem:[%s5223_s13 + $0x64] sm:$0xf] %v3777_v21 }
 0x227   : > { %897 = vst [vmem:[%s5223_s13 + $0x78] sm:$0x1] %v896_v40  ;;  %v1426_v41 = vadd.f32 %v1425_v39, %v1424_v25  ;;  %v1993_v9 = vadd.f32 %v5242_v38, %v5234_v22 }
 0x229   : > { %v1427_v52 = vrot.slane %v1426_v41, 2  ;;  %v1994_v42 = vadd.f32 %v1993_v9, %v5231_v37  ;;  %v4083_v14 = vpop.f32.mrb[28].mxu0  ;;  %v1432_v9 = vld [vmem:[%s4712_s15 + $0x1] sm:$0x1] }
 0x22a   : > { %v5250_v43 = vadd.f32 %v4083_v14, %v3938_v48  ;;  %v1979_v44 = vpop.f32.mrb[29].mxu0 }
 0x22b   : > { %v1428_v46 = vadd.f32 %v1427_v52, %v1426_v41  ;;  %v1980_v47 = vadd.f32 %v5164_v24, %v1979_v44  ;;  %v1995_v57 = vadd.f32 %v1994_v42, %v5237_v18  ;;  %v4084_v45 = vpop.f32.mrb[30].mxu0 }
 0x22c   : > { %v1982_v49 = vpop.f32.mrb[31].mxu0  ;;  %v1998_v48 = vsel %vm788_vm1, %v5250_v43, 0.0 }
 0x22d   : > { %v1429_v50 = vrot.slane %v1428_v46, 1  ;;  %v1996_v51 = vadd.f32 %v1995_v57, %v1980_v47  ;;  %v1983_v53 = vadd.f32 %v5181_v36, %v1982_v49 }
 0x22e   : > { %v3965_v54 = vpop.f32.mrb[40].mxu1 }
 0x22f   : > { %v1430_v55 = vadd.f32 %v1429_v50, %v1428_v46  ;;  %v1997_v56 = vadd.f32 %v1996_v51, %v1983_v53  ;;  %v3966_v58 = vpop.f32.mrb[41].mxu1 }
 0x230   : > { %v3967_v59 = vadd.f32 %v3966_v58, %v3965_v54  ;;  %v3968_v0 = vpop.f32.mrb[42].mxu1 }
 0x231   : > { %v1431_v4 = vmul.f32 0.020408163, %v1430_v55  ;;  %v1999_v5 = vadd.f32 %v1998_v48, %v1997_v56  ;;  %v4093_v24 = vpop.f32.mrb[32].mxu0  ;;  %v3969_v6 = vpop.f32.mrb[43].mxu1 }
 0x232   : > { %v3970_v7 = vadd.f32 %v3969_v6, %v3968_v0  ;;  %v2566_v8 = vpop.f32.mrb[33].mxu0 }
 0x233   : > { %v1433_v10 = vadd.f32 0.001, %v1431_v4  ;;  %v2000_v11 = vrot.slane %v1999_v5, 4  ;;  %v5257_v12 = vadd.f32 %v3967_v59, %v2566_v8  ;;  %v4094_v36 = vpop.f32.mrb[34].mxu0 }
 0x234   : > { %v2569_v13 = vpop.f32.mrb[35].mxu0 }
 0x235   : > { %4364 = vrsqrt.f32 %v1433_v10  ;;  %v2001_v60 = vadd.f32 %v2000_v11, %v1999_v5  ;;  %v5259_v15 = vadd.f32 %v3970_v7, %v2569_v13 }
 0x236   : > { %v3971_v61 = vpop.f32.mrb[44].mxu1 }
 0x237   : > { %v2002_v16 = vrot.slane %v2001_v60, 2  ;;  %v3972_v62 = vpop.f32.mrb[45].mxu1  ;;  %v2596_v17 = vadd.f32 %v5259_v15, %v5257_v12 }
 0x238   : > { %v3973_v63 = vadd.f32 %v3972_v62, %v3971_v61  ;;  %v3974_v19 = vpop.f32.mrb[46].mxu1 }
 0x239   : > { %v2003_v1 = vadd.f32 %v2002_v16, %v2001_v60  ;;  %v3975_v3 = vpop.f32.mrb[47].mxu1  ;;  %v5263_v20 = vpop.f32.mrb[36].mxu0  ;;  %v1498_v60 = vld [vmem:[%s5223_s13 + $0x7c] sm:$0x1] }
 0x23a   : > { %v5265_v21 = vadd.f32 %v4093_v24, %v3973_v63  ;;  %v3976_v23 = vadd.f32 %v3975_v3, %v3974_v19  ;;  %v2582_v25 = vpop.f32.mrb[37].mxu0 }
 0x23b   : > { %v2004_v32 = vrot.slane %v2003_v1, 1  ;;  %v4098_v27 = vpop.f32.mrb[38].mxu0 }
 0x23c   : > { %v2597_v39 = vadd.f32 %v2596_v17, %v5265_v21  ;;  %v5268_v40 = vadd.f32 %v4094_v36, %v3976_v23  ;;  %v5270_v41 = vpop.f32.mrb[39].mxu0 }
 0x23d   : > { %v2005_v52 = vadd.f32 %v2004_v32, %v2003_v1 }
 0x23e   : > { %v3977_v42 = vpop.f32.mrb[48].mxu1  ;;  %v2598_v14 = vadd.f32 %v2597_v39, %v5268_v40 }
 0x23f   : > { %v4365_v44 = vpop.eup %4364  ;;  %v2006_v46 = vmul.f32 0.020408163, %v2005_v52  ;;  %v3978_v57 = vpop.f32.mrb[49].mxu1 }
 0x240   : > { %v1435_v45 = vmul.f32 %v4365_v44, %v1432_v9  ;;  %v3979_v49 = vadd.f32 %v3978_v57, %v3977_v42  ;;  %v3980_v50 = vpop.f32.mrb[50].mxu1 }
 0x241   : > { %v5275_v51 = vsub.f32 %v5234_v22, %v2006_v46  ;;  %v5278_v54 = vsub.f32 %v5242_v38, %v2006_v46  ;;  %v5281_v55 = vsub.f32 %v5231_v37, %v2006_v46  ;;  %v5284_v56 = vsub.f32 %v5237_v18, %v2006_v46  ;;  %v3981_v58 = vpop.f32.mrb[51].mxu1  ;;  %v3594_v22 = vld [vmem:[%s5202_s5 + $0x1] ss:$0 sm:$0xff] }
 0x242   : > { %v1440_v48 = vrot.slane %v1435_v45, %v5190_v30  ;;  %v5287_v59 = vsub.f32 %v1980_v47, %v2006_v46  ;;  %v5289_v0 = vsub.f32 %v1983_v53, %v2006_v46  ;;  %v5292_v4 = vsub.f32 %v5250_v43, %v2006_v46 }
 0x243   : > { %v2014_v38 = vmul.f32 %v5275_v51, %v5275_v51  ;;  %v2015_v6 = vmul.f32 %v5278_v54, %v5278_v54  ;;  %v2016_v63 = vmul.f32 %v5281_v55, %v5281_v55  ;;  %v3982_v3 = vadd.f32 %v3981_v58, %v3980_v50 }
 0x244   : > { %v1442_v37 = vmul.f32 %v1440_v48, %v5166_v26  ;;  %v1443_v5 = vmul.f32 %v1440_v48, %v5168_v28  ;;  %v1444_v18 = vmul.f32 %v1440_v48, %v5171_v29  ;;  %v1445_v24 = vmul.f32 %v1440_v48, %v5173_v31 }
 0x245   : > { %v1446_v47 = vmul.f32 %v1440_v48, %v5175_v33  ;;  %v1447_v53 = vmul.f32 %v1440_v48, %v5177_v34  ;;  %v1448_v43 = vmul.f32 %v1440_v48, %v5179_v35  ;;  %v2021_v1 = vadd.f32 %v2015_v6, %v2014_v38 }
 0x246   : > { %v1456_v7 = vadd.f32 %v3594_v22, %v1442_v37  ;;  %v1457_v8 = vadd.f32 %v3594_v22, %v1443_v5  ;;  %v1458_v10 = vadd.f32 %v3594_v22, %v1444_v18  ;;  %v1459_v26 = vadd.f32 %v3594_v22, %v1445_v24  ;;  %v3983_v11 = vpop.f32.mrb[52].mxu1 }
 0x247   : > { %v1460_v28 = vadd.f32 %v3594_v22, %v1446_v47  ;;  %v1461_v29 = vadd.f32 %v3594_v22, %v1447_v53  ;;  %v1462_v31 = vadd.f32 %v3594_v22, %v1448_v43  ;;  %v3984_v33 = vpop.f32.mrb[53].mxu1  ;;  %v2583_v23 = vadd.f32 %v3979_v49, %v2582_v25 }
 0x248   : > { %v3779_v34 = vpack.c.bf16 %v1456_v7, %v1456_v7  ;;  %v3780_v36 = vpack.c.bf16 %v1457_v8, %v1457_v8  ;;  %v3781_v13 = vpack.c.bf16 %v1458_v10, %v1458_v10  ;;  %v3782_v35 = vpack.c.bf16 %v1459_v26, %v1459_v26  ;;  %v3986_v61 = vpop.f32.mrb[54].mxu1 }
 0x249   : > { %v3783_v16 = vpack.c.bf16 %v1460_v28, %v1460_v28  ;;  %v3784_v62 = vpack.c.bf16 %v1461_v29, %v1461_v29  ;;  %v3785_v17 = vpack.c.bf16 %v1462_v31, %v1462_v31  ;;  %v3987_v19 = vpop.f32.mrb[55].mxu1  ;;  %v3985_v32 = vadd.f32 %v3984_v33, %v3983_v11 }
 0x24a   : > { %1492 = vst [vmem:[%s5223_s13 + $0x4] sm:$0xf] %v3779_v34  ;;  %1493 = vst [vmem:[%s5223_s13 + $0x18] sm:$0xf] %v3780_v36  ;;  %v2017_v27 = vmul.f32 %v5284_v56, %v5284_v56  ;;  %v2022_v9 = vadd.f32 %v2021_v1, %v2016_v63  ;;  %v2599_v52 = vadd.f32 %v2598_v14, %v2583_v23 }
 0x24b   : > { %1494 = vst [vmem:[%s5223_s13 + $0x2c] sm:$0xf] %v3781_v13  ;;  %1495 = vst [vmem:[%s5223_s13 + $0x40] sm:$0xf] %v3782_v35  ;;  %v1499_v39 = vsel %vm5217_vm3, %v3785_v17, %v1498_v60  ;;  %v2586_v42 = vadd.f32 %v3982_v3, %v5270_v41  ;;  %v2591_v44 = vadd.f32 %v5263_v20, %v3985_v32 }
 0x24c   : > { %1496 = vst [vmem:[%s5223_s13 + $0x54] sm:$0xf] %v3783_v16  ;;  %1497 = vst [vmem:[%s5223_s13 + $0x68] sm:$0xf] %v3784_v62  ;;  %v2018_v46 = vmul.f32 %v5287_v59, %v5287_v59  ;;  %v2023_v25 = vadd.f32 %v2022_v9, %v2017_v27  ;;  %v2020_v49 = vmul.f32 %v5292_v4, %v5292_v4 }
 0x24d   : > { %1500 = vst [vmem:[%s5223_s13 + $0x7c] sm:$0x1] %v1499_v39  ;;  %v2600_v57 = vadd.f32 %v2599_v52, %v2586_v42  ;;  %v2601_v45 = vsel %vm788_vm1, %v2591_v44, 0.0  ;;  %v2019_v50 = vmul.f32 %v5289_v0, %v5289_v0 }
 0x24e   : > { %v2024_v58 = vadd.f32 %v2023_v25, %v2018_v46  ;;  %v2026_v20 = vsel %vm788_vm1, %v2020_v49, 0.0 }
 0x24f   : > { %v2602_v14 = vadd.f32 %v2601_v45, %v2600_v57 }
 0x250   : > { %v2025_v41 = vadd.f32 %v2024_v58, %v2019_v50 }
 0x251   : > { %v4012_v48 = vpop.f32.mrb[40].mxu0  ;;  %v2603_v22 = vrot.slane %v2602_v14, 4 }
 0x252   : > { %v4013_v38 = vpop.f32.mrb[41].mxu0  ;;  %v2027_v18 = vadd.f32 %v2026_v20, %v2025_v41 }
 0x253   : > { %v5330_v37 = vadd.f32 %v4013_v38, %v4012_v48  ;;  %v4015_v5 = vpop.f32.mrb[42].mxu0  ;;  %v2604_v24 = vadd.f32 %v2603_v22, %v2602_v14 }
 0x254   : > { %v4016_v47 = vpop.f32.mrb[43].mxu0  ;;  %v2028_v43 = vrot.slane %v2027_v18, 4 }
 0x255   : > { %v5332_v53 = vadd.f32 %v4016_v47, %v4015_v5  ;;  %v2605_v6 = vrot.slane %v2604_v24, 2 }
 0x256   : > { %v2029_v7 = vadd.f32 %v2028_v43, %v2027_v18  ;;  %v2035_v18 = vld [vmem:[%s4712_s15 + $0x2] sm:$0x1] }
 0x257   : > { %v2606_v8 = vadd.f32 %v2605_v6, %v2604_v24 }
 0x258   : > { %v2030_v26 = vrot.slane %v2029_v7, 2 }
 0x259   : > { %v4018_v10 = vpop.f32.mrb[44].mxu0  ;;  %v2607_v11 = vrot.slane %v2606_v8, 1 }
 0x25a   : > { %v4019_v28 = vpop.f32.mrb[45].mxu0  ;;  %v2031_v33 = vadd.f32 %v2030_v26, %v2029_v7 }
 0x25b   : > { %v4020_v29 = vadd.f32 %v4019_v28, %v4018_v10  ;;  %v4021_v31 = vpop.f32.mrb[46].mxu0  ;;  %v2608_v34 = vadd.f32 %v2607_v11, %v2606_v8 }
 0x25c   : > { %v4022_v36 = vpop.f32.mrb[47].mxu0  ;;  %v2032_v35 = vrot.slane %v2031_v33, 1 }
 0x25d   : > { %v4023_v13 = vadd.f32 %v4022_v36, %v4021_v31  ;;  %v2609_v60 = vmul.f32 0.020408163, %v2608_v34 }
 0x25e   : > { %v2033_v61 = vadd.f32 %v2032_v35, %v2031_v33  ;;  %v3644_v35 = vld [vmem:[%s5202_s5 + $0x2] ss:$0 sm:$0xff] }
 0x25f   : > { %v5335_v16 = vsub.f32 %v5257_v12, %v2609_v60  ;;  %v5338_v62 = vsub.f32 %v5259_v15, %v2609_v60  ;;  %v5341_v17 = vsub.f32 %v5265_v21, %v2609_v60  ;;  %v5344_v63 = vsub.f32 %v5268_v40, %v2609_v60 }
 0x260   : > { %v5346_v19 = vsub.f32 %v2583_v23, %v2609_v60  ;;  %v5348_v1 = vsub.f32 %v2586_v42, %v2609_v60  ;;  %v5350_v3 = vsub.f32 %v2591_v44, %v2609_v60  ;;  %v2034_v27 = vmul.f32 0.020408163, %v2033_v61 }
 0x261   : > { %v4024_v32 = vpop.f32.mrb[48].mxu0  ;;  %v2617_v12 = vmul.f32 %v5335_v16, %v5335_v16  ;;  %v2618_v15 = vmul.f32 %v5338_v62, %v5338_v62  ;;  %v2619_v40 = vmul.f32 %v5341_v17, %v5341_v17  ;;  %v2620_v46 = vmul.f32 %v5344_v63, %v5344_v63 }
 0x262   : > { %v4025_v39 = vpop.f32.mrb[49].mxu0  ;;  %v2036_v9 = vadd.f32 0.001, %v2034_v27  ;;  %v2621_v57 = vmul.f32 %v5346_v19, %v5346_v19  ;;  %v2623_v49 = vmul.f32 %v5350_v3, %v5350_v3  ;;  %v2622_v58 = vmul.f32 %v5348_v1, %v5348_v1 }
 0x263   : > { %v4027_v21 = vpop.f32.mrb[50].mxu0  ;;  %v2624_v23 = vadd.f32 %v2618_v15, %v2617_v12  ;;  %v5358_v52 = vadd.f32 %v4025_v39, %v4024_v32 }
 0x264   : > { %v4028_v42 = vpop.f32.mrb[51].mxu0  ;;  %4366 = vrsqrt.f32 %v2036_v9  ;;  %v2629_v5 = vsel %vm788_vm1, %v2623_v49, 0.0 }
 0x265   : > { %v5360_v44 = vadd.f32 %v4028_v42, %v4027_v21  ;;  %v2625_v25 = vadd.f32 %v2624_v23, %v2619_v40 }
 0x267   : > { %v2626_v45 = vadd.f32 %v2625_v25, %v2620_v46 }
 0x269   : > { %v4030_v50 = vpop.f32.mrb[52].mxu0  ;;  %v2627_v14 = vadd.f32 %v2626_v45, %v2621_v57  ;;  %v2101_v57 = vld [vmem:[%s5223_s13 + $0x80] sm:$0x1] }
 0x26a   : > { %v4031_v48 = vpop.f32.mrb[53].mxu0 }
 0x26b   : > { %v4032_v41 = vadd.f32 %v4031_v48, %v4030_v50  ;;  %v4033_v22 = vpop.f32.mrb[54].mxu0  ;;  %v2628_v38 = vadd.f32 %v2627_v14, %v2622_v58 }
 0x26c   : > { %v4034_v20 = vpop.f32.mrb[55].mxu0 }
 0x26d   : > { %v2630_v24 = vadd.f32 %v2629_v5, %v2628_v38 }
 0x26e   : > { %v4107_v47 = vpop.f32.mrb[56].mxu1  ;;  %v4367_v7 = vpop.eup %4366 }
 0x26f   : > { %v5372_v43 = vadd.f32 %v4107_v47, %v4020_v29  ;;  %v3169_v6 = vpop.f32.mrb[57].mxu1  ;;  %v2631_v8 = vrot.slane %v2630_v24, 4  ;;  %v2038_v11 = vmul.f32 %v4367_v7, %v2035_v18 }
 0x270   : > { %v5375_v10 = vadd.f32 %v5330_v37, %v3169_v6  ;;  %v4108_v26 = vpop.f32.mrb[58].mxu1 }
 0x271   : > { %v5377_v28 = vadd.f32 %v4108_v26, %v4023_v13  ;;  %v3172_v31 = vpop.f32.mrb[59].mxu1  ;;  %v2632_v33 = vadd.f32 %v2631_v8, %v2630_v24  ;;  %v2043_v36 = vrot.slane %v2038_v11, %v5190_v30 }
 0x272   : > { %v5380_v34 = vadd.f32 %v5332_v53, %v3172_v31 }
 0x273   : > { %v2633_v29 = vrot.slane %v2632_v33, 2  ;;  %v2045_v61 = vmul.f32 %v2043_v36, %v5275_v51  ;;  %v2046_v37 = vmul.f32 %v2043_v36, %v5278_v54  ;;  %v2047_v32 = vmul.f32 %v2043_v36, %v5281_v55 }
 0x274   : > { %v3199_v60 = vadd.f32 %v5380_v34, %v5375_v10  ;;  %v2048_v13 = vmul.f32 %v2043_v36, %v5284_v56  ;;  %v2049_v27 = vmul.f32 %v2043_v36, %v5287_v59  ;;  %v2050_v53 = vmul.f32 %v2043_v36, %v5289_v0 }
 0x275   : > { %v2051_v12 = vmul.f32 %v2043_v36, %v5292_v4  ;;  %v2634_v15 = vadd.f32 %v2633_v29, %v2632_v33  ;;  %v2059_v21 = vadd.f32 %v3644_v35, %v2045_v61  ;;  %v2060_v9 = vadd.f32 %v3644_v35, %v2046_v37 }
 0x276   : > { %v4111_v39 = vpop.f32.mrb[60].mxu1  ;;  %v2061_v40 = vadd.f32 %v3644_v35, %v2047_v32  ;;  %v2062_v23 = vadd.f32 %v3644_v35, %v2048_v13  ;;  %v2063_v54 = vadd.f32 %v3644_v35, %v2049_v27  ;;  %v2064_v55 = vadd.f32 %v3644_v35, %v2050_v53 }
 0x277   : > { %v3185_v51 = vpop.f32.mrb[61].mxu1  ;;  %v2065_v56 = vadd.f32 %v3644_v35, %v2051_v12  ;;  %v2635_v59 = vrot.slane %v2634_v15, 1  ;;  %v3786_v0 = vpack.c.bf16 %v2059_v21, %v2059_v21  ;;  %v3787_v46 = vpack.c.bf16 %v2060_v9, %v2060_v9 }
 0x278   : > { %v4112_v42 = vpop.f32.mrb[62].mxu1  ;;  %v3788_v4 = vpack.c.bf16 %v2061_v40, %v2061_v40  ;;  %v3789_v25 = vpack.c.bf16 %v2062_v23, %v2062_v23  ;;  %v3790_v49 = vpack.c.bf16 %v2063_v54, %v2063_v54  ;;  %v3791_v50 = vpack.c.bf16 %v2064_v55, %v2064_v55 }
 0x279   : > { %v3188_v45 = vpop.f32.mrb[63].mxu1  ;;  %v3792_v58 = vpack.c.bf16 %v2065_v56, %v2065_v56  ;;  %v2636_v14 = vadd.f32 %v2635_v59, %v2634_v15  ;;  %2095 = vst [vmem:[%s5223_s13 + $0x8] sm:$0xf] %v3786_v0  ;;  %2096 = vst [vmem:[%s5223_s13 + $0x1c] sm:$0xf] %v3787_v46  ;;  %v3200_v48 = vadd.f32 %v3199_v60, %v5372_v43 }
 0x27a   : > { %2097 = vst [vmem:[%s5223_s13 + $0x30] sm:$0xf] %v3788_v4  ;;  %2098 = vst [vmem:[%s5223_s13 + $0x44] sm:$0xf] %v3789_v25  ;;  %v3194_v22 = vadd.f32 %v4111_v39, %v4032_v41  ;;  %v3186_v38 = vadd.f32 %v5358_v52, %v3185_v51  ;;  %v3189_v20 = vadd.f32 %v5360_v44, %v3188_v45  ;;  %v2638_v44 = vld [vmem:[%s4712_s15 + $0x3] sm:$0x1] }
 0x27b   : > { %2099 = vst [vmem:[%s5223_s13 + $0x58] sm:$0xf] %v3790_v49  ;;  %2100 = vst [vmem:[%s5223_s13 + $0x6c] sm:$0xf] %v3791_v50  ;;  %v2102_v5 = vsel %vm5217_vm3, %v3792_v58, %v2101_v57  ;;  %v2637_v18 = vmul.f32 0.020408163, %v2636_v14  ;;  %v3201_v24 = vadd.f32 %v3200_v48, %v5377_v28 }
 0x27c   : > { %2103 = vst [vmem:[%s5223_s13 + $0x80] sm:$0x1] %v2102_v5  ;;  %v3204_v41 = vsel %vm788_vm1, %v3194_v22, 0.0  ;;  %v3694_v60 = vld [vmem:[%s5202_s5 + $0x3] ss:$0 sm:$0xff] }
 0x27d   : > { %v2639_v47 = vadd.f32 0.001, %v2637_v18  ;;  %v3202_v6 = vadd.f32 %v3201_v24, %v3186_v38 }
 0x27f   : > { %4368 = vrsqrt.f32 %v2639_v47  ;;  %v3203_v7 = vadd.f32 %v3202_v6, %v3189_v20 }
 0x281   : > { %v3205_v52 = vadd.f32 %v3204_v41, %v3203_v7 }
 0x283   : > { %v3206_v8 = vrot.slane %v3205_v52, 4 }
 0x285   : > { %v3207_v26 = vadd.f32 %v3206_v8, %v3205_v52 }
 0x287   : > { %v3208_v11 = vrot.slane %v3207_v26, 2 }
 0x289   : > { %v4369_v31 = vpop.eup %4368  ;;  %v3209_v36 = vadd.f32 %v3208_v11, %v3207_v26 }
 0x28a   : > { %v2641_v33 = vmul.f32 %v4369_v31, %v2638_v44  ;;  %v3241_v44 = vld [vmem:[%s4712_s15 + $0x4] sm:$0x1] }
 0x28b   : > { %v3210_v29 = vrot.slane %v3209_v36, 1 }
 0x28c   : > { %v2646_v35 = vrot.slane %v2641_v33, %v5190_v30 }
 0x28d   : > { %v3211_v15 = vadd.f32 %v3210_v29, %v3209_v36  ;;  %v3744_v36 = vld [vmem:[%s5202_s5 + $0x4] ss:$0 sm:$0xff] }
 0x28e   : > { %v2648_v61 = vmul.f32 %v2646_v35, %v5335_v16  ;;  %v2649_v37 = vmul.f32 %v2646_v35, %v5338_v62  ;;  %v2650_v32 = vmul.f32 %v2646_v35, %v5341_v17  ;;  %v2651_v13 = vmul.f32 %v2646_v35, %v5344_v63 }
 0x28f   : > { %v2652_v27 = vmul.f32 %v2646_v35, %v5346_v19  ;;  %v2653_v53 = vmul.f32 %v2646_v35, %v5348_v1  ;;  %v2654_v12 = vmul.f32 %v2646_v35, %v5350_v3  ;;  %v3212_v63 = vmul.f32 0.020408163, %v3211_v15  ;;  %v2704_v3 = vld [vmem:[%s5223_s13 + $0x84] sm:$0x1] }
 0x290   : > { %v2662_v39 = vadd.f32 %v3694_v60, %v2648_v61  ;;  %v2663_v21 = vadd.f32 %v3694_v60, %v2649_v37  ;;  %v2664_v9 = vadd.f32 %v3694_v60, %v2650_v32  ;;  %v2665_v16 = vadd.f32 %v3694_v60, %v2651_v13 }
 0x291   : > { %v2666_v62 = vadd.f32 %v3694_v60, %v2652_v27  ;;  %v2667_v17 = vadd.f32 %v3694_v60, %v2653_v53  ;;  %v2668_v40 = vadd.f32 %v3694_v60, %v2654_v12  ;;  %v3213_v59 = vsub.f32 %v5375_v10, %v3212_v63 }
 0x292   : > { %v3793_v23 = vpack.c.bf16 %v2662_v39, %v2662_v39  ;;  %v3794_v19 = vpack.c.bf16 %v2663_v21, %v2663_v21  ;;  %v3795_v51 = vpack.c.bf16 %v2664_v9, %v2664_v9  ;;  %v3796_v1 = vpack.c.bf16 %v2665_v16, %v2665_v16 }
 0x293   : > { %v3797_v54 = vpack.c.bf16 %v2666_v62, %v2666_v62  ;;  %v3798_v55 = vpack.c.bf16 %v2667_v17, %v2667_v17  ;;  %v3799_v56 = vpack.c.bf16 %v2668_v40, %v2668_v40  ;;  %v3214_v42 = vsub.f32 %v5380_v34, %v3212_v63  ;;  %v3307_v40 = vld [vmem:[%s5223_s13 + $0x88] sm:$0x1] }
 0x294   : > { %2698 = vst [vmem:[%s5223_s13 + $0xc] sm:$0xf] %v3793_v23  ;;  %2699 = vst [vmem:[%s5223_s13 + $0x20] sm:$0xf] %v3794_v19  ;;  %v3215_v0 = vsub.f32 %v5372_v43, %v3212_v63  ;;  %v3216_v46 = vsub.f32 %v5377_v28, %v3212_v63  ;;  %v3217_v4 = vsub.f32 %v3186_v38, %v3212_v63 }
 0x295   : > { %2700 = vst [vmem:[%s5223_s13 + $0x34] sm:$0xf] %v3795_v51  ;;  %2701 = vst [vmem:[%s5223_s13 + $0x48] sm:$0xf] %v3796_v1  ;;  %v2705_v25 = vsel %vm5217_vm3, %v3799_v56, %v2704_v3  ;;  %v3218_v57 = vsub.f32 %v3189_v20, %v3212_v63  ;;  %v3219_v45 = vsub.f32 %v3194_v22, %v3212_v63  ;;  %v3334_v1 = vld [vmem:[%s5223_s13] sm:$0xff] (%p5530_p1) }
 0x296   : > { %2702 = vst [vmem:[%s5223_s13 + $0x5c] sm:$0xf] %v3797_v54  ;;  %2703 = vst [vmem:[%s5223_s13 + $0x70] sm:$0xf] %v3798_v55  ;;  %v3220_v49 = vmul.f32 %v3213_v59, %v3213_v59  ;;  %v3221_v10 = vmul.f32 %v3214_v42, %v3214_v42  ;;  %v3222_v50 = vmul.f32 %v3215_v0, %v3215_v0  ;;  %v3338_v54 = vld [vmem:[%s5223_s13 + $0x14] sm:$0xff] (%p5530_p1)  ;;  %v3342_v55 = vld [vmem:[%s5223_s13 + $0x28] sm:$0xff] (%p5530_p1) }
 0x297   : > { %2706 = vst [vmem:[%s5223_s13 + $0x84] sm:$0x1] %v2705_v25  ;;  %v3223_v14 = vmul.f32 %v3216_v46, %v3216_v46  ;;  %v3224_v34 = vmul.f32 %v3217_v4, %v3217_v4  ;;  %v3226_v43 = vmul.f32 %v3219_v45, %v3219_v45  ;;  %v3225_v28 = vmul.f32 %v3218_v57, %v3218_v57 }
 0x298   : > { %v3227_v58 = vadd.f32 %v3221_v10, %v3220_v49  ;;  %3335 = vst [vmem:[%s5458_s18] sm:$0xff] (%p5530_p1), %v3334_v1  ;;  %3339 = vst [vmem:[%s5458_s18 + $0x3c] sm:$0xff] (%p5530_p1), %v3338_v54 }
 0x299   : > { %v3232_v24 = vsel %vm788_vm1, %v3226_v43, 0.0  ;;  %3343 = vst [vmem:[%s5458_s18 + $0x78] sm:$0xff] (%p5530_p1), %v3342_v55 }
 0x29a   : > { %v3228_v48 = vadd.f32 %v3227_v58, %v3222_v50 }
 0x29b   : > { %v3336_v3 = vld [vmem:[%s5223_s13 + $0x8] sm:$0xff] (%p5530_p1)  ;;  %v3340_v2 = vld [vmem:[%s5223_s13 + $0x1c] sm:$0xff] (%p5530_p1) }
 0x29c   : > { %v3229_v5 = vadd.f32 %v3228_v48, %v3223_v14  ;;  %v3344_v56 = vld [vmem:[%s5223_s13 + $0x30] sm:$0xff] (%p5530_p1)  ;;  %3337 = vst [vmem:[%s5458_s18 + $0x8] sm:$0xff] (%p5530_p1), %v3336_v3  ;;  %3341 = vst [vmem:[%s5458_s18 + $0x44] sm:$0xff] (%p5530_p1), %v3340_v2 }
 0x29d   : > { %3345 = vst [vmem:[%s5458_s18 + $0x80] sm:$0xff] (%p5530_p1), %v3344_v56  ;;  %v3356_v25 = vld [vmem:[%s5223_s13 + $0x6c] sm:$0xff] (%p5530_p1) }
 0x29e   : > { %v3230_v38 = vadd.f32 %v3229_v5, %v3224_v34  ;;  %3357 = vst [vmem:[%s5458_s18 + $0x134] sm:$0xff] (%p5530_p1), %v3356_v25 }
 0x2a0   : > { %v3231_v18 = vadd.f32 %v3230_v38, %v3225_v28 }
 0x2a2   : > { %v3233_v47 = vadd.f32 %v3232_v24, %v3231_v18 }
 0x2a4   : > { %v3234_v20 = vrot.slane %v3233_v47, 4 }
 0x2a6   : > { %v3235_v22 = vadd.f32 %v3234_v20, %v3233_v47 }
 0x2a8   : > { %v3236_v6 = vrot.slane %v3235_v22, 2 }
 0x2aa   : > { %v3237_v7 = vadd.f32 %v3236_v6, %v3235_v22 }
 0x2ac   : > { %v3238_v41 = vrot.slane %v3237_v7, 1 }
 0x2ae   : > { %v3239_v52 = vadd.f32 %v3238_v41, %v3237_v7 }
 0x2b0   : > { %v3240_v8 = vmul.f32 0.020408163, %v3239_v52 }
 0x2b2   : > { %v3242_v26 = vadd.f32 0.001, %v3240_v8 }
 0x2b4   : > { %4370 = vrsqrt.f32 %v3242_v26 }
 0x2be   : > { %v4371_v11 = vpop.eup %4370 }
 0x2bf   : > { %v3244_v31 = vmul.f32 %v4371_v11, %v3241_v44 }
 0x2c1   : > { %v3249_v33 = vrot.slane %v3244_v31, %v5190_v30 }
 0x2c3   : > { %v3251_v35 = vmul.f32 %v3249_v33, %v3213_v59  ;;  %v3252_v29 = vmul.f32 %v3249_v33, %v3214_v42  ;;  %v3253_v60 = vmul.f32 %v3249_v33, %v3215_v0  ;;  %v3254_v61 = vmul.f32 %v3249_v33, %v3216_v46  ;;  %v3346_v59 = vld [vmem:[%s5223_s13 + $0x3c] sm:$0xff] (%p5530_p1)  ;;  %v3348_v42 = vld [vmem:[%s5223_s13 + $0x44] sm:$0xff] (%p5530_p1)  ;;  %v3350_v0 = vld [vmem:[%s5223_s13 + $0x50] sm:$0xff] (%p5530_p1) }
 0x2c4   : > { %v3255_v37 = vmul.f32 %v3249_v33, %v3217_v4  ;;  %v3256_v32 = vmul.f32 %v3249_v33, %v3218_v57  ;;  %v3257_v13 = vmul.f32 %v3249_v33, %v3219_v45  ;;  %3347 = vst [vmem:[%s5458_s18 + $0xb4] sm:$0xff] (%p5530_p1), %v3346_v59  ;;  %3349 = vst [vmem:[%s5458_s18 + $0xbc] sm:$0xff] (%p5530_p1), %v3348_v42  ;;  %v3352_v46 = vld [vmem:[%s5223_s13 + $0x58] sm:$0xff] (%p5530_p1)  ;;  %v3354_v4 = vld [vmem:[%s5223_s13 + $0x64] sm:$0xff] (%p5530_p1) }
 0x2c5   : > { %v3265_v27 = vadd.f32 %v3744_v36, %v3251_v35  ;;  %v3266_v53 = vadd.f32 %v3744_v36, %v3252_v29  ;;  %v3267_v12 = vadd.f32 %v3744_v36, %v3253_v60  ;;  %v3268_v15 = vadd.f32 %v3744_v36, %v3254_v61  ;;  %3351 = vst [vmem:[%s5458_s18 + $0xf0] sm:$0xff] (%p5530_p1), %v3350_v0  ;;  %v3358_v57 = vld [vmem:[%s5223_s13 + $0x78] sm:$0xff] (%p5530_p1)  ;;  %v3360_v45 = vld [vmem:[%s5223_s13 + $0x80] sm:$0xff] (%p5530_p1) }
 0x2c6   : > { %v3269_v39 = vadd.f32 %v3744_v36, %v3255_v37  ;;  %v3270_v30 = vadd.f32 %v3744_v36, %v3256_v32  ;;  %v3271_v21 = vadd.f32 %v3744_v36, %v3257_v13  ;;  %3316 = sbr.rel (!%p5530_p1) target bundleno = 726 (0x2d6), region = 52  ;;  %3353 = vst [vmem:[%s5458_s18 + $0xf8] sm:$0xff] (%p5530_p1), %v3352_v46  ;;  %3355 = vst [vmem:[%s5458_s18 + $0x12c] sm:$0xff] (%p5530_p1), %v3354_v4 }
 0x2c7   : > { %v3800_v9 = vpack.c.bf16 %v3265_v27, %v3265_v27  ;;  %v3801_v16 = vpack.c.bf16 %v3266_v53, %v3266_v53  ;;  %v3802_v62 = vpack.c.bf16 %v3267_v12, %v3267_v12  ;;  %v3803_v17 = vpack.c.bf16 %v3268_v15, %v3268_v15  ;;  %3359 = vst [vmem:[%s5458_s18 + $0x168] sm:$0xff] (%p5530_p1), %v3358_v57 }
 0x2c8   : > { %v3804_v63 = vpack.c.bf16 %v3269_v39, %v3269_v39  ;;  %v3805_v23 = vpack.c.bf16 %v3270_v30, %v3270_v30  ;;  %v3806_v19 = vpack.c.bf16 %v3271_v21, %v3271_v21  ;;  %3361 = vst [vmem:[%s5458_s18 + $0x170] sm:$0xff] (%p5530_p1), %v3360_v45 }
 0x2c9   : > { %3301 = vst [vmem:[%s5223_s13 + $0x10] sm:$0xf] %v3800_v9  ;;  %3302 = vst [vmem:[%s5223_s13 + $0x24] sm:$0xf] %v3801_v16 }
 0x2ca   : > { %3303 = vst [vmem:[%s5223_s13 + $0x38] sm:$0xf] %v3802_v62  ;;  %3304 = vst [vmem:[%s5223_s13 + $0x4c] sm:$0xf] %v3803_v17  ;;  %v3308_v51 = vsel %vm5217_vm3, %v3806_v19, %v3307_v40 }
 0x2cb   : > { %3305 = vst [vmem:[%s5223_s13 + $0x60] sm:$0xf] %v3804_v63  ;;  %3306 = vst [vmem:[%s5223_s13 + $0x74] sm:$0xf] %v3805_v23 }
 0x2cc   : > { %3309 = vst [vmem:[%s5223_s13 + $0x88] sm:$0x1] %v3308_v51 }
 0x2d0   : > { %v3753_v49 = vld [vmem:[%s5223_s13 + $0x10] sm:$0xf]  ;;  %v3755_v10 = vld [vmem:[%s5223_s13 + $0x24] sm:$0xf] }
 0x2d1   : > { %3754 = vst [vmem:[%s5458_s18 + $0x10] sm:$0xf] %v3753_v49  ;;  %v3757_v50 = vld [vmem:[%s5223_s13 + $0x38] sm:$0xf]  ;;  %v3759_v58 = vld [vmem:[%s5223_s13 + $0x4c] sm:$0xf] }
 0x2d2   : > { %3756 = vst [vmem:[%s5458_s18 + $0x4c] sm:$0xf] %v3755_v10  ;;  %3758 = vst [vmem:[%s5458_s18 + $0x88] sm:$0xf] %v3757_v50  ;;  %v3761_v14 = vld [vmem:[%s5223_s13 + $0x60] sm:$0xf] }
 0x2d3   : > { %3760 = vst [vmem:[%s5458_s18 + $0xc4] sm:$0xf] %v3759_v58  ;;  %v3763_v48 = vld [vmem:[%s5223_s13 + $0x74] sm:$0xf]  ;;  %v3765_v34 = vld [vmem:[%s5223_s13 + $0x88] sm:$0xf] }
 0x2d4   : > { %3762 = vst [vmem:[%s5458_s18 + $0x100] sm:$0xf] %v3761_v14  ;;  %3764 = vst [vmem:[%s5458_s18 + $0x13c] sm:$0xf] %v3763_v48 }
 0x2d5   : > { %3766 = vst [vmem:[%s5458_s18 + $0x178] sm:$0xf] %v3765_v34 }
 0x2d6 PF: > { %p17_p2 = scmp.ge.s32.totalorder %s4555_s20, 5   ;;  %s5531_s15 = smov %s4492_s16 }
 0x2d7   : > { %s5532_s16 = smov %s4496_s17  ;;  %s5533_s17 = smov %s4565_s23 }
 0x2d8   : > { %s5534_s18 = smov %s4555_s20  ;;  %19 = sbr.rel (!%p17_p2) target bundleno = 7 (0x7), region = 132 }
 0x2df   :  { %3398 = vsyncpa [#allocation3], 1 }
 0x2e0   :  { %3400 = vsyncpa [#allocation3 + $0x1], 1 }
 0x2e1   :  { %3401 = vsyncpa [#allocation5], 1 }
 0x2e2   :  { %3403 = vsyncpa [#allocation5 + $0x1], 1 }

</bundles_post_ra>
